<compile_context>
chip_gen: v7x
topology: tpu7x:2x2x1
jax: 0.10.0
libtpu: 0.0.40
codegen_flags: <defaults>
</compile_context>

<pallas_src>
import math

import jax
import jax.numpy as jnp
from jax import lax
from jax.experimental import pallas as pl
from jax.experimental.pallas import tpu as pltpu


# ----------------------------------------------------------------------------
# Fused kernel
# ----------------------------------------------------------------------------
def _make_fused_kernel(*, B, W, D, depth, heads, dim_head, mlp_dim):
    N = W + 1                      # tokens per batch element (cls + patches)
    inner = heads * dim_head
    scale = dim_head ** -0.5
    inv_sqrt2 = 1.0 / math.sqrt(2.0)
    bf16 = jnp.bfloat16
    f32 = jnp.float32

    def layernorm(t, g, b):
        mu = jnp.mean(t, axis=-1, keepdims=True)
        var = jnp.mean((t - mu) ** 2, axis=-1, keepdims=True)
        return (t - mu) * lax.rsqrt(var + 1e-5) * g + b

    def kernel(patches_ref, pw_ref, pb_ref, cls_ref, pos_ref,
               g1_ref, b1_ref, wqkv_ref, wo_ref, bo_ref,
               g2_ref, b2_ref, w1_ref, bm1_ref, w2_ref, bm2_ref,
               out_ref, attn_scr):
        # ---- patch embedding: (B*W, patch_dim) @ (patch_dim, D) + b ----
        pe = jnp.dot(patches_ref[...].astype(bf16), pw_ref[...],
                     preferred_element_type=f32) + pb_ref[...]

        # ---- prepend cls token, add positional embedding (flattened B*N) ----
        cls_tok = cls_ref[...] + pos_ref[0:1, :]        # (1, D)
        pos_rest = pos_ref[1:N, :]                      # (W, D)
        rows = []
        for b in range(B):
            rows.append(cls_tok)
            rows.append(pe[b * W:(b + 1) * W, :] + pos_rest)
        x = jnp.concatenate(rows, axis=0)               # (B*N, D), f32
        # emb_dropout: identity at inference (p = 0.0)

        for d in range(depth):
            # ---------------- attention (PreNorm, residual) ----------------
            xn = layernorm(x, g1_ref[d], b1_ref[d])
            qkv = jnp.dot(xn.astype(bf16), wqkv_ref[d],
                          preferred_element_type=f32)   # (B*N, 3*inner), f32

            # gather per-(batch, head) q/k/v tiles into one leading batch axis
            q_l, k_l, v_l = [], [], []
            for b in range(B):
                r0 = b * N
                for h in range(heads):
                    c0 = h * dim_head
                    q_l.append(qkv[r0:r0 + N, c0:c0 + dim_head])
                    k_l.append(qkv[r0:r0 + N,
                                   inner + c0:inner + c0 + dim_head])
                    v_l.append(qkv[r0:r0 + N,
                                   2 * inner + c0:2 * inner + c0 + dim_head])
            q = jnp.stack(q_l, axis=0).astype(bf16)     # (B*heads, N, dh)
            k = jnp.stack(k_l, axis=0).astype(bf16)
            v = jnp.stack(v_l, axis=0).astype(bf16)

            # batched Q @ K^T  (batch dim = B*heads)
            dots = lax.dot_general(q, k, (((2,), (2,)), ((0,), (0,))),
                                   preferred_element_type=f32) * scale
            dots = dots - jnp.max(dots, axis=-1, keepdims=True)
            e = jnp.exp(dots)
            attn = e * pl.reciprocal(jnp.sum(e, axis=-1, keepdims=True),
                                     approx=True)
            # batched attn @ V
            ctx = lax.dot_general(attn.astype(bf16), v,
                                  (((2,), (1,)), ((0,), (0,))),
                                  preferred_element_type=f32)  # (B*heads,N,dh)

            # write head outputs straight into contiguous (B*N, inner) layout
            for b in range(B):
                for h in range(heads):
                    attn_scr[b * N:(b + 1) * N,
                             h * dim_head:(h + 1) * dim_head] = \
                        ctx[b * heads + h]

            attn_out = jnp.dot(attn_scr[...].astype(bf16), wo_ref[d],
                               preferred_element_type=f32) + bo_ref[d]
            x = x + attn_out                            # residual

            # ---------------- feed-forward (PreNorm, residual) --------------
            xn = layernorm(x, g2_ref[d], b2_ref[d])
            h1 = jnp.dot(xn.astype(bf16), w1_ref[d],
                         preferred_element_type=f32) + bm1_ref[d]
            # exact GELU (matches torch.nn.GELU default)
            h1 = 0.5 * h1 * (1.0 + lax.erf(h1 * inv_sqrt2))
            y = jnp.dot(h1.astype(bf16), w2_ref[d],
                        preferred_element_type=f32) + bm2_ref[d]
            x = x + y                                   # residual

        # ---- pool == 'cls': take token 0 of each batch element ----
        for b in range(B):
            out_ref[b:b + 1, :] = x[b * N:b * N + 1, :]

    return kernel


# ----------------------------------------------------------------------------
# Forward wrapper (rearrange glue in XLA, everything else in the fused kernel)
# ----------------------------------------------------------------------------
def make_forward(cfg):
    C, P, S = cfg["channels"], cfg["patch_size"], cfg["sig_size"]
    D, depth = cfg["dim"], cfg["depth"]
    heads, dim_head, mlp = cfg["heads"], cfg["dim_head"], cfg["mlp_dim"]
    W = S // P
    N = W + 1
    inner = heads * dim_head
    bf16 = jnp.bfloat16

    @jax.jit
    def forward(img, params):
        B = img.shape[0]
        # Rearrange('b c (w p1) -> b w (p1 c)') -- layout plumbing, leave to XLA
        patches = img.reshape(B, C, W, P)
        patches = jnp.transpose(patches, (0, 2, 3, 1)).reshape(B * W, P * C)

        kernel = _make_fused_kernel(B=B, W=W, D=D, depth=depth, heads=heads,
                                    dim_head=dim_head, mlp_dim=mlp)

        args = (
            patches,
            params["patch_w"].astype(bf16),
            params["patch_b"],
            params["cls_token"],
            params["pos_embedding"],
            params["g1"], params["b1"],
            params["wqkv"].astype(bf16),
            params["wo"].astype(bf16),
            params["bo"],
            params["g2"], params["b2"],
            params["w1"].astype(bf16),
            params["bm1"],
            params["w2"].astype(bf16),
            params["bm2"],
        )
        return pl.pallas_call(
            kernel,
            out_shape=jax.ShapeDtypeStruct((B, D), jnp.float32),
            scratch_shapes=[pltpu.VMEM((B * N, inner), jnp.float32)],
        )(*args)

    return forward


# ----------------------------------------------------------------------------
# Deterministic parameter init (weights stored (in_dim, out_dim), per-layer
# tensors stacked along a leading `depth` axis)
# ----------------------------------------------------------------------------
def init_params(key, cfg):
    C, P, D = cfg["channels"], cfg["patch_size"], cfg["dim"]
    S, depth = cfg["sig_size"], cfg["depth"]
    heads, dim_head, mlp = cfg["heads"], cfg["dim_head"], cfg["mlp_dim"]
    inner = heads * dim_head
    W = S // P
    N = W + 1
    patch_dim = C * P

    def nrm(k, shape, scale=0.02):
        return scale * jax.random.normal(k, shape, jnp.float32)

    keys = jax.random.split(key, 3 + 4 * depth)
    params = {
        "patch_w": nrm(keys[0], (patch_dim, D)),
        "patch_b": jnp.zeros((1, D), jnp.float32),
        "pos_embedding": jax.random.normal(keys[1], (N, D), jnp.float32),
        "cls_token": jax.random.normal(keys[2], (1, D), jnp.float32),
        "g1": jnp.ones((depth, 1, D), jnp.float32),
        "b1": jnp.zeros((depth, 1, D), jnp.float32),
        "wqkv": jnp.stack([nrm(keys[3 + 4 * i + 0], (D, 3 * inner))
                           for i in range(depth)]),
        "wo": jnp.stack([nrm(keys[3 + 4 * i + 1], (inner, D))
                         for i in range(depth)]),
        "bo": jnp.zeros((depth, 1, D), jnp.float32),
        "g2": jnp.ones((depth, 1, D), jnp.float32),
        "b2": jnp.zeros((depth, 1, D), jnp.float32),
        "w1": jnp.stack([nrm(keys[3 + 4 * i + 2], (D, mlp))
                         for i in range(depth)]),
        "bm1": jnp.zeros((depth, 1, mlp), jnp.float32),
        "w2": jnp.stack([nrm(keys[3 + 4 * i + 3], (mlp, D))
                         for i in range(depth)]),
        "bm2": jnp.zeros((depth, 1, D), jnp.float32),
    }
    return params


# ----------------------------------------------------------------------------
if __name__ == "__main__":
    cfg = dict(sig_size=16, patch_size=4, channels=4, dim=32, depth=2,
               heads=4, dim_head=8, mlp_dim=64)

    key = jax.random.PRNGKey(0)
    k_param, k_img = jax.random.split(key)
    params = init_params(k_param, cfg)

    img = jax.random.normal(k_img, (2, cfg["channels"], cfg["sig_size"]),
                            jnp.float32)

    forward = make_forward(cfg)
    out = forward(img, params)
    jax.block_until_ready(out)
    assert out.shape == (2, cfg["dim"])
    print("KERNEL_OK")
</pallas_src>

<mosaic_0001>
module attributes {stable_mosaic.version = 11 : i64} {
  func.func @kernel(%arg0: memref<8x16xf32, #tpu.memory_space<vmem>>, %arg1: memref<16x32xbf16, #tpu.memory_space<vmem>>, %arg2: memref<1x32xf32, #tpu.memory_space<vmem>>, %arg3: memref<1x32xf32, #tpu.memory_space<vmem>>, %arg4: memref<5x32xf32, #tpu.memory_space<vmem>>, %arg5: memref<2x1x32xf32, #tpu.memory_space<vmem>>, %arg6: memref<2x1x32xf32, #tpu.memory_space<vmem>>, %arg7: memref<2x32x96xbf16, #tpu.memory_space<vmem>>, %arg8: memref<2x32x32xbf16, #tpu.memory_space<vmem>>, %arg9: memref<2x1x32xf32, #tpu.memory_space<vmem>>, %arg10: memref<2x1x32xf32, #tpu.memory_space<vmem>>, %arg11: memref<2x1x32xf32, #tpu.memory_space<vmem>>, %arg12: memref<2x32x64xbf16, #tpu.memory_space<vmem>>, %arg13: memref<2x1x64xf32, #tpu.memory_space<vmem>>, %arg14: memref<2x64x32xbf16, #tpu.memory_space<vmem>>, %arg15: memref<2x1x32xf32, #tpu.memory_space<vmem>>, %arg16: memref<2x32xf32, #tpu.memory_space<vmem>>, %arg17: memref<10x32xf32, #tpu.memory_space<vmem>>) attributes {dimension_semantics = [], scalar_prefetch = 0 : i64, scratch_operands = 1 : i64, tpu.core_type = #tpu.core_type<tc>} {
    %c0 = arith.constant 0 : index
    %c0_0 = arith.constant 0 : index
    %0 = vector.load %arg0[%c0, %c0_0] : memref<8x16xf32, #tpu.memory_space<vmem>>, vector<8x16xf32>
    %1 = arith.truncf %0 : vector<8x16xf32> to vector<8x16xbf16>
    %c0_1 = arith.constant 0 : index
    %c0_2 = arith.constant 0 : index
    %2 = vector.load %arg1[%c0_1, %c0_2] : memref<16x32xbf16, #tpu.memory_space<vmem>>, vector<16x32xbf16>
    %cst = arith.constant dense<0.000000e+00> : vector<8x32xf32>
    %3 = tpu.matmul %1, %2, %cst {dimension_numbers = #tpu.dot_dimension_numbers<[1], [0], [0], [1], [0, 0, 1, 1], [], []>} : vector<8x16xbf16>, vector<16x32xbf16>, vector<8x32xf32> -> vector<8x32xf32>
    %c0_3 = arith.constant 0 : index
    %c0_4 = arith.constant 0 : index
    %4 = vector.load %arg2[%c0_3, %c0_4] : memref<1x32xf32, #tpu.memory_space<vmem>>, vector<1x32xf32>
    %5 = vector.broadcast %4 : vector<1x32xf32> to vector<8x32xf32>
    %6 = arith.addf %3, %5 : vector<8x32xf32>
    %c0_5 = arith.constant 0 : index
    %c0_6 = arith.constant 0 : index
    %7 = vector.load %arg3[%c0_5, %c0_6] : memref<1x32xf32, #tpu.memory_space<vmem>>, vector<1x32xf32>
    %c0_7 = arith.constant 0 : index
    %c0_8 = arith.constant 0 : index
    %8 = vector.load %arg4[%c0_7, %c0_8] : memref<5x32xf32, #tpu.memory_space<vmem>>, vector<1x32xf32>
    %9 = arith.addf %7, %8 : vector<1x32xf32>
    %c1 = arith.constant 1 : index
    %c0_9 = arith.constant 0 : index
    %10 = vector.load %arg4[%c1, %c0_9] : memref<5x32xf32, #tpu.memory_space<vmem>>, vector<4x32xf32>
    %11 = vector.extract_strided_slice %6 {offsets = [0, 0], sizes = [4, 32], strides = [1, 1]} : vector<8x32xf32> to vector<4x32xf32>
    %12 = arith.addf %11, %10 : vector<4x32xf32>
    %13 = vector.extract_strided_slice %6 {offsets = [4, 0], sizes = [4, 32], strides = [1, 1]} : vector<8x32xf32> to vector<4x32xf32>
    %14 = arith.addf %13, %10 : vector<4x32xf32>
    %15 = tpu.concatenate %9, %12, %9, %14 in 0 : vector<1x32xf32>, vector<4x32xf32>, vector<1x32xf32>, vector<4x32xf32> -> vector<10x32xf32>
    %c0_10 = arith.constant 0 : index
    %c0_11 = arith.constant 0 : index
    %c0_12 = arith.constant 0 : index
    %16 = vector.load %arg5[%c0_10, %c0_11, %c0_12] : memref<2x1x32xf32, #tpu.memory_space<vmem>>, vector<1x1x32xf32>
    %17 = vector.shape_cast %16 : vector<1x1x32xf32> to vector<1x32xf32>
    %c0_13 = arith.constant 0 : index
    %c0_14 = arith.constant 0 : index
    %c0_15 = arith.constant 0 : index
    %18 = vector.load %arg6[%c0_13, %c0_14, %c0_15] : memref<2x1x32xf32, #tpu.memory_space<vmem>>, vector<1x1x32xf32>
    %19 = vector.shape_cast %18 : vector<1x1x32xf32> to vector<1x32xf32>
    %cst_16 = arith.constant dense<0.000000e+00> : vector<10xf32>
    %20 = vector.multi_reduction <add>, %15, %cst_16 [1] : vector<10x32xf32> to vector<10xf32>
    %21 = vector.shape_cast %20 : vector<10xf32> to vector<10x1xf32>
    %cst_17 = arith.constant 3.200000e+01 : f32
    %22 = vector.broadcast %cst_17 : f32 to vector<10x1xf32>
    %23 = arith.divf %21, %22 : vector<10x1xf32>
    %24 = vector.broadcast %23 : vector<10x1xf32> to vector<10x32xf32>
    %25 = arith.subf %15, %24 : vector<10x32xf32>
    %26 = arith.mulf %25, %25 : vector<10x32xf32>
    %cst_18 = arith.constant dense<0.000000e+00> : vector<10xf32>
    %27 = vector.multi_reduction <add>, %26, %cst_18 [1] : vector<10x32xf32> to vector<10xf32>
    %28 = vector.shape_cast %27 : vector<10xf32> to vector<10x1xf32>
    %cst_19 = arith.constant 3.200000e+01 : f32
    %29 = vector.broadcast %cst_19 : f32 to vector<10x1xf32>
    %30 = arith.divf %28, %29 : vector<10x1xf32>
    %31 = vector.broadcast %23 : vector<10x1xf32> to vector<10x32xf32>
    %32 = arith.subf %15, %31 : vector<10x32xf32>
    %cst_20 = arith.constant 9.99999974E-6 : f32
    %33 = vector.broadcast %cst_20 : f32 to vector<10x1xf32>
    %34 = arith.addf %30, %33 : vector<10x1xf32>
    %35 = math.rsqrt %34 : vector<10x1xf32>
    %36 = vector.broadcast %35 : vector<10x1xf32> to vector<10x32xf32>
    %37 = arith.mulf %32, %36 : vector<10x32xf32>
    %38 = vector.broadcast %17 : vector<1x32xf32> to vector<10x32xf32>
    %39 = arith.mulf %37, %38 : vector<10x32xf32>
    %40 = vector.broadcast %19 : vector<1x32xf32> to vector<10x32xf32>
    %41 = arith.addf %39, %40 : vector<10x32xf32>
    %42 = arith.truncf %41 : vector<10x32xf32> to vector<10x32xbf16>
    %c0_21 = arith.constant 0 : index
    %c0_22 = arith.constant 0 : index
    %c0_23 = arith.constant 0 : index
    %43 = vector.load %arg7[%c0_21, %c0_22, %c0_23] : memref<2x32x96xbf16, #tpu.memory_space<vmem>>, vector<1x32x96xbf16>
    %44 = vector.shape_cast %43 : vector<1x32x96xbf16> to vector<32x96xbf16>
    %cst_24 = arith.constant dense<0.000000e+00> : vector<10x96xf32>
    %45 = tpu.matmul %42, %44, %cst_24 {dimension_numbers = #tpu.dot_dimension_numbers<[1], [0], [0], [1], [0, 0, 1, 1], [], []>} : vector<10x32xbf16>, vector<32x96xbf16>, vector<10x96xf32> -> vector<10x96xf32>
    %46 = vector.extract_strided_slice %45 {offsets = [0, 0], sizes = [5, 8], strides = [1, 1]} : vector<10x96xf32> to vector<5x8xf32>
    %47 = vector.extract_strided_slice %45 {offsets = [0, 32], sizes = [5, 8], strides = [1, 1]} : vector<10x96xf32> to vector<5x8xf32>
    %48 = vector.extract_strided_slice %45 {offsets = [0, 64], sizes = [5, 8], strides = [1, 1]} : vector<10x96xf32> to vector<5x8xf32>
    %49 = vector.extract_strided_slice %45 {offsets = [0, 8], sizes = [5, 8], strides = [1, 1]} : vector<10x96xf32> to vector<5x8xf32>
    %50 = vector.extract_strided_slice %45 {offsets = [0, 40], sizes = [5, 8], strides = [1, 1]} : vector<10x96xf32> to vector<5x8xf32>
    %51 = vector.extract_strided_slice %45 {offsets = [0, 72], sizes = [5, 8], strides = [1, 1]} : vector<10x96xf32> to vector<5x8xf32>
    %52 = vector.extract_strided_slice %45 {offsets = [0, 16], sizes = [5, 8], strides = [1, 1]} : vector<10x96xf32> to vector<5x8xf32>
    %53 = vector.extract_strided_slice %45 {offsets = [0, 48], sizes = [5, 8], strides = [1, 1]} : vector<10x96xf32> to vector<5x8xf32>
    %54 = vector.extract_strided_slice %45 {offsets = [0, 80], sizes = [5, 8], strides = [1, 1]} : vector<10x96xf32> to vector<5x8xf32>
    %55 = vector.extract_strided_slice %45 {offsets = [0, 24], sizes = [5, 8], strides = [1, 1]} : vector<10x96xf32> to vector<5x8xf32>
    %56 = vector.extract_strided_slice %45 {offsets = [0, 56], sizes = [5, 8], strides = [1, 1]} : vector<10x96xf32> to vector<5x8xf32>
    %57 = vector.extract_strided_slice %45 {offsets = [0, 88], sizes = [5, 8], strides = [1, 1]} : vector<10x96xf32> to vector<5x8xf32>
    %58 = vector.extract_strided_slice %45 {offsets = [5, 0], sizes = [5, 8], strides = [1, 1]} : vector<10x96xf32> to vector<5x8xf32>
    %59 = vector.extract_strided_slice %45 {offsets = [5, 32], sizes = [5, 8], strides = [1, 1]} : vector<10x96xf32> to vector<5x8xf32>
    %60 = vector.extract_strided_slice %45 {offsets = [5, 64], sizes = [5, 8], strides = [1, 1]} : vector<10x96xf32> to vector<5x8xf32>
    %61 = vector.extract_strided_slice %45 {offsets = [5, 8], sizes = [5, 8], strides = [1, 1]} : vector<10x96xf32> to vector<5x8xf32>
    %62 = vector.extract_strided_slice %45 {offsets = [5, 40], sizes = [5, 8], strides = [1, 1]} : vector<10x96xf32> to vector<5x8xf32>
    %63 = vector.extract_strided_slice %45 {offsets = [5, 72], sizes = [5, 8], strides = [1, 1]} : vector<10x96xf32> to vector<5x8xf32>
    %64 = vector.extract_strided_slice %45 {offsets = [5, 16], sizes = [5, 8], strides = [1, 1]} : vector<10x96xf32> to vector<5x8xf32>
    %65 = vector.extract_strided_slice %45 {offsets = [5, 48], sizes = [5, 8], strides = [1, 1]} : vector<10x96xf32> to vector<5x8xf32>
    %66 = vector.extract_strided_slice %45 {offsets = [5, 80], sizes = [5, 8], strides = [1, 1]} : vector<10x96xf32> to vector<5x8xf32>
    %67 = vector.extract_strided_slice %45 {offsets = [5, 24], sizes = [5, 8], strides = [1, 1]} : vector<10x96xf32> to vector<5x8xf32>
    %68 = vector.extract_strided_slice %45 {offsets = [5, 56], sizes = [5, 8], strides = [1, 1]} : vector<10x96xf32> to vector<5x8xf32>
    %69 = vector.extract_strided_slice %45 {offsets = [5, 88], sizes = [5, 8], strides = [1, 1]} : vector<10x96xf32> to vector<5x8xf32>
    %70 = vector.shape_cast %46 : vector<5x8xf32> to vector<1x5x8xf32>
    %71 = vector.shape_cast %49 : vector<5x8xf32> to vector<1x5x8xf32>
    %72 = vector.shape_cast %52 : vector<5x8xf32> to vector<1x5x8xf32>
    %73 = vector.shape_cast %55 : vector<5x8xf32> to vector<1x5x8xf32>
    %74 = vector.shape_cast %58 : vector<5x8xf32> to vector<1x5x8xf32>
    %75 = vector.shape_cast %61 : vector<5x8xf32> to vector<1x5x8xf32>
    %76 = vector.shape_cast %64 : vector<5x8xf32> to vector<1x5x8xf32>
    %77 = vector.shape_cast %67 : vector<5x8xf32> to vector<1x5x8xf32>
    %78 = tpu.concatenate %70, %71, %72, %73, %74, %75, %76, %77 in 0 : vector<1x5x8xf32>, vector<1x5x8xf32>, vector<1x5x8xf32>, vector<1x5x8xf32>, vector<1x5x8xf32>, vector<1x5x8xf32>, vector<1x5x8xf32>, vector<1x5x8xf32> -> vector<8x5x8xf32>
    %79 = arith.truncf %78 : vector<8x5x8xf32> to vector<8x5x8xbf16>
    %80 = vector.shape_cast %47 : vector<5x8xf32> to vector<1x5x8xf32>
    %81 = vector.shape_cast %50 : vector<5x8xf32> to vector<1x5x8xf32>
    %82 = vector.shape_cast %53 : vector<5x8xf32> to vector<1x5x8xf32>
    %83 = vector.shape_cast %56 : vector<5x8xf32> to vector<1x5x8xf32>
    %84 = vector.shape_cast %59 : vector<5x8xf32> to vector<1x5x8xf32>
    %85 = vector.shape_cast %62 : vector<5x8xf32> to vector<1x5x8xf32>
    %86 = vector.shape_cast %65 : vector<5x8xf32> to vector<1x5x8xf32>
    %87 = vector.shape_cast %68 : vector<5x8xf32> to vector<1x5x8xf32>
    %88 = tpu.concatenate %80, %81, %82, %83, %84, %85, %86, %87 in 0 : vector<1x5x8xf32>, vector<1x5x8xf32>, vector<1x5x8xf32>, vector<1x5x8xf32>, vector<1x5x8xf32>, vector<1x5x8xf32>, vector<1x5x8xf32>, vector<1x5x8xf32> -> vector<8x5x8xf32>
    %89 = arith.truncf %88 : vector<8x5x8xf32> to vector<8x5x8xbf16>
    %90 = vector.shape_cast %48 : vector<5x8xf32> to vector<1x5x8xf32>
    %91 = vector.shape_cast %51 : vector<5x8xf32> to vector<1x5x8xf32>
    %92 = vector.shape_cast %54 : vector<5x8xf32> to vector<1x5x8xf32>
    %93 = vector.shape_cast %57 : vector<5x8xf32> to vector<1x5x8xf32>
    %94 = vector.shape_cast %60 : vector<5x8xf32> to vector<1x5x8xf32>
    %95 = vector.shape_cast %63 : vector<5x8xf32> to vector<1x5x8xf32>
    %96 = vector.shape_cast %66 : vector<5x8xf32> to vector<1x5x8xf32>
    %97 = vector.shape_cast %69 : vector<5x8xf32> to vector<1x5x8xf32>
    %98 = tpu.concatenate %90, %91, %92, %93, %94, %95, %96, %97 in 0 : vector<1x5x8xf32>, vector<1x5x8xf32>, vector<1x5x8xf32>, vector<1x5x8xf32>, vector<1x5x8xf32>, vector<1x5x8xf32>, vector<1x5x8xf32>, vector<1x5x8xf32> -> vector<8x5x8xf32>
    %99 = arith.truncf %98 : vector<8x5x8xf32> to vector<8x5x8xbf16>
    %cst_25 = arith.constant dense<0.000000e+00> : vector<8x5x5xf32>
    %100 = tpu.matmul %79, %89, %cst_25 {dimension_numbers = #tpu.dot_dimension_numbers<[2], [2], [1], [1], [0, 0, 0, 1, 1, 1], [0], [0]>} : vector<8x5x8xbf16>, vector<8x5x8xbf16>, vector<8x5x5xf32> -> vector<8x5x5xf32>
    %cst_26 = arith.constant 0.353553385 : f32
    %101 = vector.broadcast %cst_26 : f32 to vector<8x5x5xf32>
    %102 = arith.mulf %100, %101 : vector<8x5x5xf32>
    %cst_27 = arith.constant dense<0xFF800000> : vector<8x5xf32>
    %103 = vector.multi_reduction <maximumf>, %102, %cst_27 [2] : vector<8x5x5xf32> to vector<8x5xf32>
    %104 = vector.shape_cast %103 : vector<8x5xf32> to vector<8x5x1xf32>
    %105 = vector.broadcast %104 : vector<8x5x1xf32> to vector<8x5x5xf32>
    %106 = arith.subf %102, %105 : vector<8x5x5xf32>
    %107 = math.exp %106 : vector<8x5x5xf32>
    %cst_28 = arith.constant dense<0.000000e+00> : vector<8x5xf32>
    %108 = vector.multi_reduction <add>, %107, %cst_28 [2] : vector<8x5x5xf32> to vector<8x5xf32>
    %109 = vector.shape_cast %108 : vector<8x5xf32> to vector<8x5x1xf32>
    %110 = tpu.reciprocal %109 {approx = true} : vector<8x5x1xf32> -> vector<8x5x1xf32>
    %111 = vector.broadcast %110 : vector<8x5x1xf32> to vector<8x5x5xf32>
    %112 = arith.mulf %107, %111 : vector<8x5x5xf32>
    %113 = arith.truncf %112 : vector<8x5x5xf32> to vector<8x5x5xbf16>
    %cst_29 = arith.constant dense<0.000000e+00> : vector<8x5x8xf32>
    %114 = tpu.matmul %113, %99, %cst_29 {dimension_numbers = #tpu.dot_dimension_numbers<[2], [1], [1], [2], [0, 0, 0, 1, 1, 2], [0], [0]>} : vector<8x5x5xbf16>, vector<8x5x8xbf16>, vector<8x5x8xf32> -> vector<8x5x8xf32>
    %115 = vector.extract_strided_slice %114 {offsets = [0, 0, 0], sizes = [1, 5, 8], strides = [1, 1, 1]} : vector<8x5x8xf32> to vector<1x5x8xf32>
    %116 = vector.shape_cast %115 : vector<1x5x8xf32> to vector<5x8xf32>
    %c0_30 = arith.constant 0 : index
    %c0_31 = arith.constant 0 : index
    %117 = vector.load %arg17[%c0_30, %c0_31] : memref<10x32xf32, #tpu.memory_space<vmem>>, vector<5x8xf32>
    tpu.vector_store %arg17[%c0_30, %c0_31], %116 {strides = array<i32>} : memref<10x32xf32, #tpu.memory_space<vmem>>, vector<5x8xf32>,
    %118 = vector.extract_strided_slice %114 {offsets = [1, 0, 0], sizes = [1, 5, 8], strides = [1, 1, 1]} : vector<8x5x8xf32> to vector<1x5x8xf32>
    %119 = vector.shape_cast %118 : vector<1x5x8xf32> to vector<5x8xf32>
    %c0_32 = arith.constant 0 : index
    %c8 = arith.constant 8 : index
    %120 = vector.load %arg17[%c0_32, %c8] : memref<10x32xf32, #tpu.memory_space<vmem>>, vector<5x8xf32>
    tpu.vector_store %arg17[%c0_32, %c8], %119 {strides = array<i32>} : memref<10x32xf32, #tpu.memory_space<vmem>>, vector<5x8xf32>,
    %121 = vector.extract_strided_slice %114 {offsets = [2, 0, 0], sizes = [1, 5, 8], strides = [1, 1, 1]} : vector<8x5x8xf32> to vector<1x5x8xf32>
    %122 = vector.shape_cast %121 : vector<1x5x8xf32> to vector<5x8xf32>
    %c0_33 = arith.constant 0 : index
    %c16 = arith.constant 16 : index
    %123 = vector.load %arg17[%c0_33, %c16] : memref<10x32xf32, #tpu.memory_space<vmem>>, vector<5x8xf32>
    tpu.vector_store %arg17[%c0_33, %c16], %122 {strides = array<i32>} : memref<10x32xf32, #tpu.memory_space<vmem>>, vector<5x8xf32>,
    %124 = vector.extract_strided_slice %114 {offsets = [3, 0, 0], sizes = [1, 5, 8], strides = [1, 1, 1]} : vector<8x5x8xf32> to vector<1x5x8xf32>
    %125 = vector.shape_cast %124 : vector<1x5x8xf32> to vector<5x8xf32>
    %c0_34 = arith.constant 0 : index
    %c24 = arith.constant 24 : index
    %126 = vector.load %arg17[%c0_34, %c24] : memref<10x32xf32, #tpu.memory_space<vmem>>, vector<5x8xf32>
    tpu.vector_store %arg17[%c0_34, %c24], %125 {strides = array<i32>} : memref<10x32xf32, #tpu.memory_space<vmem>>, vector<5x8xf32>,
    %127 = vector.extract_strided_slice %114 {offsets = [4, 0, 0], sizes = [1, 5, 8], strides = [1, 1, 1]} : vector<8x5x8xf32> to vector<1x5x8xf32>
    %128 = vector.shape_cast %127 : vector<1x5x8xf32> to vector<5x8xf32>
    %c5 = arith.constant 5 : index
    %c0_35 = arith.constant 0 : index
    %129 = vector.load %arg17[%c5, %c0_35] : memref<10x32xf32, #tpu.memory_space<vmem>>, vector<5x8xf32>
    tpu.vector_store %arg17[%c5, %c0_35], %128 {strides = array<i32>} : memref<10x32xf32, #tpu.memory_space<vmem>>, vector<5x8xf32>,
    %130 = vector.extract_strided_slice %114 {offsets = [5, 0, 0], sizes = [1, 5, 8], strides = [1, 1, 1]} : vector<8x5x8xf32> to vector<1x5x8xf32>
    %131 = vector.shape_cast %130 : vector<1x5x8xf32> to vector<5x8xf32>
    %c5_36 = arith.constant 5 : index
    %c8_37 = arith.constant 8 : index
    %132 = vector.load %arg17[%c5_36, %c8_37] : memref<10x32xf32, #tpu.memory_space<vmem>>, vector<5x8xf32>
    tpu.vector_store %arg17[%c5_36, %c8_37], %131 {strides = array<i32>} : memref<10x32xf32, #tpu.memory_space<vmem>>, vector<5x8xf32>,
    %133 = vector.extract_strided_slice %114 {offsets = [6, 0, 0], sizes = [1, 5, 8], strides = [1, 1, 1]} : vector<8x5x8xf32> to vector<1x5x8xf32>
    %134 = vector.shape_cast %133 : vector<1x5x8xf32> to vector<5x8xf32>
    %c5_38 = arith.constant 5 : index
    %c16_39 = arith.constant 16 : index
    %135 = vector.load %arg17[%c5_38, %c16_39] : memref<10x32xf32, #tpu.memory_space<vmem>>, vector<5x8xf32>
    tpu.vector_store %arg17[%c5_38, %c16_39], %134 {strides = array<i32>} : memref<10x32xf32, #tpu.memory_space<vmem>>, vector<5x8xf32>,
    %136 = vector.extract_strided_slice %114 {offsets = [7, 0, 0], sizes = [1, 5, 8], strides = [1, 1, 1]} : vector<8x5x8xf32> to vector<1x5x8xf32>
    %137 = vector.shape_cast %136 : vector<1x5x8xf32> to vector<5x8xf32>
    %c5_40 = arith.constant 5 : index
    %c24_41 = arith.constant 24 : index
    %138 = vector.load %arg17[%c5_40, %c24_41] : memref<10x32xf32, #tpu.memory_space<vmem>>, vector<5x8xf32>
    tpu.vector_store %arg17[%c5_40, %c24_41], %137 {strides = array<i32>} : memref<10x32xf32, #tpu.memory_space<vmem>>, vector<5x8xf32>,
    %c0_42 = arith.constant 0 : index
    %c0_43 = arith.constant 0 : index
    %139 = vector.load %arg17[%c0_42, %c0_43] : memref<10x32xf32, #tpu.memory_space<vmem>>, vector<10x32xf32>
    %140 = arith.truncf %139 : vector<10x32xf32> to vector<10x32xbf16>
    %c0_44 = arith.constant 0 : index
    %c0_45 = arith.constant 0 : index
    %c0_46 = arith.constant 0 : index
    %141 = vector.load %arg8[%c0_44, %c0_45, %c0_46] : memref<2x32x32xbf16, #tpu.memory_space<vmem>>, vector<1x32x32xbf16>
    %142 = vector.shape_cast %141 : vector<1x32x32xbf16> to vector<32x32xbf16>
    %cst_47 = arith.constant dense<0.000000e+00> : vector<10x32xf32>
    %143 = tpu.matmul %140, %142, %cst_47 {dimension_numbers = #tpu.dot_dimension_numbers<[1], [0], [0], [1], [0, 0, 1, 1], [], []>} : vector<10x32xbf16>, vector<32x32xbf16>, vector<10x32xf32> -> vector<10x32xf32>
    %c0_48 = arith.constant 0 : index
    %c0_49 = arith.constant 0 : index
    %c0_50 = arith.constant 0 : index
    %144 = vector.load %arg9[%c0_48, %c0_49, %c0_50] : memref<2x1x32xf32, #tpu.memory_space<vmem>>, vector<1x1x32xf32>
    %145 = vector.shape_cast %144 : vector<1x1x32xf32> to vector<1x32xf32>
    %146 = vector.broadcast %145 : vector<1x32xf32> to vector<10x32xf32>
    %147 = arith.addf %143, %146 : vector<10x32xf32>
    %148 = arith.addf %15, %147 : vector<10x32xf32>
    %c0_51 = arith.constant 0 : index
    %c0_52 = arith.constant 0 : index
    %c0_53 = arith.constant 0 : index
    %149 = vector.load %arg10[%c0_51, %c0_52, %c0_53] : memref<2x1x32xf32, #tpu.memory_space<vmem>>, vector<1x1x32xf32>
    %150 = vector.shape_cast %149 : vector<1x1x32xf32> to vector<1x32xf32>
    %c0_54 = arith.constant 0 : index
    %c0_55 = arith.constant 0 : index
    %c0_56 = arith.constant 0 : index
    %151 = vector.load %arg11[%c0_54, %c0_55, %c0_56] : memref<2x1x32xf32, #tpu.memory_space<vmem>>, vector<1x1x32xf32>
    %152 = vector.shape_cast %151 : vector<1x1x32xf32> to vector<1x32xf32>
    %cst_57 = arith.constant dense<0.000000e+00> : vector<10xf32>
    %153 = vector.multi_reduction <add>, %148, %cst_57 [1] : vector<10x32xf32> to vector<10xf32>
    %154 = vector.shape_cast %153 : vector<10xf32> to vector<10x1xf32>
    %cst_58 = arith.constant 3.200000e+01 : f32
    %155 = vector.broadcast %cst_58 : f32 to vector<10x1xf32>
    %156 = arith.divf %154, %155 : vector<10x1xf32>
    %157 = vector.broadcast %156 : vector<10x1xf32> to vector<10x32xf32>
    %158 = arith.subf %148, %157 : vector<10x32xf32>
    %159 = arith.mulf %158, %158 : vector<10x32xf32>
    %cst_59 = arith.constant dense<0.000000e+00> : vector<10xf32>
    %160 = vector.multi_reduction <add>, %159, %cst_59 [1] : vector<10x32xf32> to vector<10xf32>
    %161 = vector.shape_cast %160 : vector<10xf32> to vector<10x1xf32>
    %cst_60 = arith.constant 3.200000e+01 : f32
    %162 = vector.broadcast %cst_60 : f32 to vector<10x1xf32>
    %163 = arith.divf %161, %162 : vector<10x1xf32>
    %164 = vector.broadcast %156 : vector<10x1xf32> to vector<10x32xf32>
    %165 = arith.subf %148, %164 : vector<10x32xf32>
    %cst_61 = arith.constant 9.99999974E-6 : f32
    %166 = vector.broadcast %cst_61 : f32 to vector<10x1xf32>
    %167 = arith.addf %163, %166 : vector<10x1xf32>
    %168 = math.rsqrt %167 : vector<10x1xf32>
    %169 = vector.broadcast %168 : vector<10x1xf32> to vector<10x32xf32>
    %170 = arith.mulf %165, %169 : vector<10x32xf32>
    %171 = vector.broadcast %150 : vector<1x32xf32> to vector<10x32xf32>
    %172 = arith.mulf %170, %171 : vector<10x32xf32>
    %173 = vector.broadcast %152 : vector<1x32xf32> to vector<10x32xf32>
    %174 = arith.addf %172, %173 : vector<10x32xf32>
    %175 = arith.truncf %174 : vector<10x32xf32> to vector<10x32xbf16>
    %c0_62 = arith.constant 0 : index
    %c0_63 = arith.constant 0 : index
    %c0_64 = arith.constant 0 : index
    %176 = vector.load %arg12[%c0_62, %c0_63, %c0_64] : memref<2x32x64xbf16, #tpu.memory_space<vmem>>, vector<1x32x64xbf16>
    %177 = vector.shape_cast %176 : vector<1x32x64xbf16> to vector<32x64xbf16>
    %cst_65 = arith.constant dense<0.000000e+00> : vector<10x64xf32>
    %178 = tpu.matmul %175, %177, %cst_65 {dimension_numbers = #tpu.dot_dimension_numbers<[1], [0], [0], [1], [0, 0, 1, 1], [], []>} : vector<10x32xbf16>, vector<32x64xbf16>, vector<10x64xf32> -> vector<10x64xf32>
    %c0_66 = arith.constant 0 : index
    %c0_67 = arith.constant 0 : index
    %c0_68 = arith.constant 0 : index
    %179 = vector.load %arg13[%c0_66, %c0_67, %c0_68] : memref<2x1x64xf32, #tpu.memory_space<vmem>>, vector<1x1x64xf32>
    %180 = vector.shape_cast %179 : vector<1x1x64xf32> to vector<1x64xf32>
    %181 = vector.broadcast %180 : vector<1x64xf32> to vector<10x64xf32>
    %182 = arith.addf %178, %181 : vector<10x64xf32>
    %cst_69 = arith.constant 5.000000e-01 : f32
    %183 = vector.broadcast %cst_69 : f32 to vector<10x64xf32>
    %184 = arith.mulf %183, %182 : vector<10x64xf32>
    %cst_70 = arith.constant 0.707106769 : f32
    %185 = vector.broadcast %cst_70 : f32 to vector<10x64xf32>
    %186 = arith.mulf %182, %185 : vector<10x64xf32>
    %187 = math.erf %186 : vector<10x64xf32>
    %cst_71 = arith.constant 1.000000e+00 : f32
    %188 = vector.broadcast %cst_71 : f32 to vector<10x64xf32>
    %189 = arith.addf %188, %187 : vector<10x64xf32>
    %190 = arith.mulf %184, %189 : vector<10x64xf32>
    %191 = arith.truncf %190 : vector<10x64xf32> to vector<10x64xbf16>
    %c0_72 = arith.constant 0 : index
    %c0_73 = arith.constant 0 : index
    %c0_74 = arith.constant 0 : index
    %192 = vector.load %arg14[%c0_72, %c0_73, %c0_74] : memref<2x64x32xbf16, #tpu.memory_space<vmem>>, vector<1x64x32xbf16>
    %193 = vector.shape_cast %192 : vector<1x64x32xbf16> to vector<64x32xbf16>
    %cst_75 = arith.constant dense<0.000000e+00> : vector<10x32xf32>
    %194 = tpu.matmul %191, %193, %cst_75 {dimension_numbers = #tpu.dot_dimension_numbers<[1], [0], [0], [1], [0, 0, 1, 1], [], []>} : vector<10x64xbf16>, vector<64x32xbf16>, vector<10x32xf32> -> vector<10x32xf32>
    %c0_76 = arith.constant 0 : index
    %c0_77 = arith.constant 0 : index
    %c0_78 = arith.constant 0 : index
    %195 = vector.load %arg15[%c0_76, %c0_77, %c0_78] : memref<2x1x32xf32, #tpu.memory_space<vmem>>, vector<1x1x32xf32>
    %196 = vector.shape_cast %195 : vector<1x1x32xf32> to vector<1x32xf32>
    %197 = vector.broadcast %196 : vector<1x32xf32> to vector<10x32xf32>
    %198 = arith.addf %194, %197 : vector<10x32xf32>
    %199 = arith.addf %148, %198 : vector<10x32xf32>
    %c1_79 = arith.constant 1 : index
    %c0_80 = arith.constant 0 : index
    %c0_81 = arith.constant 0 : index
    %200 = vector.load %arg5[%c1_79, %c0_80, %c0_81] : memref<2x1x32xf32, #tpu.memory_space<vmem>>, vector<1x1x32xf32>
    %201 = vector.shape_cast %200 : vector<1x1x32xf32> to vector<1x32xf32>
    %c1_82 = arith.constant 1 : index
    %c0_83 = arith.constant 0 : index
    %c0_84 = arith.constant 0 : index
    %202 = vector.load %arg6[%c1_82, %c0_83, %c0_84] : memref<2x1x32xf32, #tpu.memory_space<vmem>>, vector<1x1x32xf32>
    %203 = vector.shape_cast %202 : vector<1x1x32xf32> to vector<1x32xf32>
    %cst_85 = arith.constant dense<0.000000e+00> : vector<10xf32>
    %204 = vector.multi_reduction <add>, %199, %cst_85 [1] : vector<10x32xf32> to vector<10xf32>
    %205 = vector.shape_cast %204 : vector<10xf32> to vector<10x1xf32>
    %cst_86 = arith.constant 3.200000e+01 : f32
    %206 = vector.broadcast %cst_86 : f32 to vector<10x1xf32>
    %207 = arith.divf %205, %206 : vector<10x1xf32>
    %208 = vector.broadcast %207 : vector<10x1xf32> to vector<10x32xf32>
    %209 = arith.subf %199, %208 : vector<10x32xf32>
    %210 = arith.mulf %209, %209 : vector<10x32xf32>
    %cst_87 = arith.constant dense<0.000000e+00> : vector<10xf32>
    %211 = vector.multi_reduction <add>, %210, %cst_87 [1] : vector<10x32xf32> to vector<10xf32>
    %212 = vector.shape_cast %211 : vector<10xf32> to vector<10x1xf32>
    %cst_88 = arith.constant 3.200000e+01 : f32
    %213 = vector.broadcast %cst_88 : f32 to vector<10x1xf32>
    %214 = arith.divf %212, %213 : vector<10x1xf32>
    %215 = vector.broadcast %207 : vector<10x1xf32> to vector<10x32xf32>
    %216 = arith.subf %199, %215 : vector<10x32xf32>
    %cst_89 = arith.constant 9.99999974E-6 : f32
    %217 = vector.broadcast %cst_89 : f32 to vector<10x1xf32>
    %218 = arith.addf %214, %217 : vector<10x1xf32>
    %219 = math.rsqrt %218 : vector<10x1xf32>
    %220 = vector.broadcast %219 : vector<10x1xf32> to vector<10x32xf32>
    %221 = arith.mulf %216, %220 : vector<10x32xf32>
    %222 = vector.broadcast %201 : vector<1x32xf32> to vector<10x32xf32>
    %223 = arith.mulf %221, %222 : vector<10x32xf32>
    %224 = vector.broadcast %203 : vector<1x32xf32> to vector<10x32xf32>
    %225 = arith.addf %223, %224 : vector<10x32xf32>
    %226 = arith.truncf %225 : vector<10x32xf32> to vector<10x32xbf16>
    %c1_90 = arith.constant 1 : index
    %c0_91 = arith.constant 0 : index
    %c0_92 = arith.constant 0 : index
    %227 = vector.load %arg7[%c1_90, %c0_91, %c0_92] : memref<2x32x96xbf16, #tpu.memory_space<vmem>>, vector<1x32x96xbf16>
    %228 = vector.shape_cast %227 : vector<1x32x96xbf16> to vector<32x96xbf16>
    %cst_93 = arith.constant dense<0.000000e+00> : vector<10x96xf32>
    %229 = tpu.matmul %226, %228, %cst_93 {dimension_numbers = #tpu.dot_dimension_numbers<[1], [0], [0], [1], [0, 0, 1, 1], [], []>} : vector<10x32xbf16>, vector<32x96xbf16>, vector<10x96xf32> -> vector<10x96xf32>
    %230 = vector.extract_strided_slice %229 {offsets = [0, 0], sizes = [5, 8], strides = [1, 1]} : vector<10x96xf32> to vector<5x8xf32>
    %231 = vector.extract_strided_slice %229 {offsets = [0, 32], sizes = [5, 8], strides = [1, 1]} : vector<10x96xf32> to vector<5x8xf32>
    %232 = vector.extract_strided_slice %229 {offsets = [0, 64], sizes = [5, 8], strides = [1, 1]} : vector<10x96xf32> to vector<5x8xf32>
    %233 = vector.extract_strided_slice %229 {offsets = [0, 8], sizes = [5, 8], strides = [1, 1]} : vector<10x96xf32> to vector<5x8xf32>
    %234 = vector.extract_strided_slice %229 {offsets = [0, 40], sizes = [5, 8], strides = [1, 1]} : vector<10x96xf32> to vector<5x8xf32>
    %235 = vector.extract_strided_slice %229 {offsets = [0, 72], sizes = [5, 8], strides = [1, 1]} : vector<10x96xf32> to vector<5x8xf32>
    %236 = vector.extract_strided_slice %229 {offsets = [0, 16], sizes = [5, 8], strides = [1, 1]} : vector<10x96xf32> to vector<5x8xf32>
    %237 = vector.extract_strided_slice %229 {offsets = [0, 48], sizes = [5, 8], strides = [1, 1]} : vector<10x96xf32> to vector<5x8xf32>
    %238 = vector.extract_strided_slice %229 {offsets = [0, 80], sizes = [5, 8], strides = [1, 1]} : vector<10x96xf32> to vector<5x8xf32>
    %239 = vector.extract_strided_slice %229 {offsets = [0, 24], sizes = [5, 8], strides = [1, 1]} : vector<10x96xf32> to vector<5x8xf32>
    %240 = vector.extract_strided_slice %229 {offsets = [0, 56], sizes = [5, 8], strides = [1, 1]} : vector<10x96xf32> to vector<5x8xf32>
    %241 = vector.extract_strided_slice %229 {offsets = [0, 88], sizes = [5, 8], strides = [1, 1]} : vector<10x96xf32> to vector<5x8xf32>
    %242 = vector.extract_strided_slice %229 {offsets = [5, 0], sizes = [5, 8], strides = [1, 1]} : vector<10x96xf32> to vector<5x8xf32>
    %243 = vector.extract_strided_slice %229 {offsets = [5, 32], sizes = [5, 8], strides = [1, 1]} : vector<10x96xf32> to vector<5x8xf32>
    %244 = vector.extract_strided_slice %229 {offsets = [5, 64], sizes = [5, 8], strides = [1, 1]} : vector<10x96xf32> to vector<5x8xf32>
    %245 = vector.extract_strided_slice %229 {offsets = [5, 8], sizes = [5, 8], strides = [1, 1]} : vector<10x96xf32> to vector<5x8xf32>
    %246 = vector.extract_strided_slice %229 {offsets = [5, 40], sizes = [5, 8], strides = [1, 1]} : vector<10x96xf32> to vector<5x8xf32>
    %247 = vector.extract_strided_slice %229 {offsets = [5, 72], sizes = [5, 8], strides = [1, 1]} : vector<10x96xf32> to vector<5x8xf32>
    %248 = vector.extract_strided_slice %229 {offsets = [5, 16], sizes = [5, 8], strides = [1, 1]} : vector<10x96xf32> to vector<5x8xf32>
    %249 = vector.extract_strided_slice %229 {offsets = [5, 48], sizes = [5, 8], strides = [1, 1]} : vector<10x96xf32> to vector<5x8xf32>
    %250 = vector.extract_strided_slice %229 {offsets = [5, 80], sizes = [5, 8], strides = [1, 1]} : vector<10x96xf32> to vector<5x8xf32>
    %251 = vector.extract_strided_slice %229 {offsets = [5, 24], sizes = [5, 8], strides = [1, 1]} : vector<10x96xf32> to vector<5x8xf32>
    %252 = vector.extract_strided_slice %229 {offsets = [5, 56], sizes = [5, 8], strides = [1, 1]} : vector<10x96xf32> to vector<5x8xf32>
    %253 = vector.extract_strided_slice %229 {offsets = [5, 88], sizes = [5, 8], strides = [1, 1]} : vector<10x96xf32> to vector<5x8xf32>
    %254 = vector.shape_cast %230 : vector<5x8xf32> to vector<1x5x8xf32>
    %255 = vector.shape_cast %233 : vector<5x8xf32> to vector<1x5x8xf32>
    %256 = vector.shape_cast %236 : vector<5x8xf32> to vector<1x5x8xf32>
    %257 = vector.shape_cast %239 : vector<5x8xf32> to vector<1x5x8xf32>
    %258 = vector.shape_cast %242 : vector<5x8xf32> to vector<1x5x8xf32>
    %259 = vector.shape_cast %245 : vector<5x8xf32> to vector<1x5x8xf32>
    %260 = vector.shape_cast %248 : vector<5x8xf32> to vector<1x5x8xf32>
    %261 = vector.shape_cast %251 : vector<5x8xf32> to vector<1x5x8xf32>
    %262 = tpu.concatenate %254, %255, %256, %257, %258, %259, %260, %261 in 0 : vector<1x5x8xf32>, vector<1x5x8xf32>, vector<1x5x8xf32>, vector<1x5x8xf32>, vector<1x5x8xf32>, vector<1x5x8xf32>, vector<1x5x8xf32>, vector<1x5x8xf32> -> vector<8x5x8xf32>
    %263 = arith.truncf %262 : vector<8x5x8xf32> to vector<8x5x8xbf16>
    %264 = vector.shape_cast %231 : vector<5x8xf32> to vector<1x5x8xf32>
    %265 = vector.shape_cast %234 : vector<5x8xf32> to vector<1x5x8xf32>
    %266 = vector.shape_cast %237 : vector<5x8xf32> to vector<1x5x8xf32>
    %267 = vector.shape_cast %240 : vector<5x8xf32> to vector<1x5x8xf32>
    %268 = vector.shape_cast %243 : vector<5x8xf32> to vector<1x5x8xf32>
    %269 = vector.shape_cast %246 : vector<5x8xf32> to vector<1x5x8xf32>
    %270 = vector.shape_cast %249 : vector<5x8xf32> to vector<1x5x8xf32>
    %271 = vector.shape_cast %252 : vector<5x8xf32> to vector<1x5x8xf32>
    %272 = tpu.concatenate %264, %265, %266, %267, %268, %269, %270, %271 in 0 : vector<1x5x8xf32>, vector<1x5x8xf32>, vector<1x5x8xf32>, vector<1x5x8xf32>, vector<1x5x8xf32>, vector<1x5x8xf32>, vector<1x5x8xf32>, vector<1x5x8xf32> -> vector<8x5x8xf32>
    %273 = arith.truncf %272 : vector<8x5x8xf32> to vector<8x5x8xbf16>
    %274 = vector.shape_cast %232 : vector<5x8xf32> to vector<1x5x8xf32>
    %275 = vector.shape_cast %235 : vector<5x8xf32> to vector<1x5x8xf32>
    %276 = vector.shape_cast %238 : vector<5x8xf32> to vector<1x5x8xf32>
    %277 = vector.shape_cast %241 : vector<5x8xf32> to vector<1x5x8xf32>
    %278 = vector.shape_cast %244 : vector<5x8xf32> to vector<1x5x8xf32>
    %279 = vector.shape_cast %247 : vector<5x8xf32> to vector<1x5x8xf32>
    %280 = vector.shape_cast %250 : vector<5x8xf32> to vector<1x5x8xf32>
    %281 = vector.shape_cast %253 : vector<5x8xf32> to vector<1x5x8xf32>
    %282 = tpu.concatenate %274, %275, %276, %277, %278, %279, %280, %281 in 0 : vector<1x5x8xf32>, vector<1x5x8xf32>, vector<1x5x8xf32>, vector<1x5x8xf32>, vector<1x5x8xf32>, vector<1x5x8xf32>, vector<1x5x8xf32>, vector<1x5x8xf32> -> vector<8x5x8xf32>
    %283 = arith.truncf %282 : vector<8x5x8xf32> to vector<8x5x8xbf16>
    %cst_94 = arith.constant dense<0.000000e+00> : vector<8x5x5xf32>
    %284 = tpu.matmul %263, %273, %cst_94 {dimension_numbers = #tpu.dot_dimension_numbers<[2], [2], [1], [1], [0, 0, 0, 1, 1, 1], [0], [0]>} : vector<8x5x8xbf16>, vector<8x5x8xbf16>, vector<8x5x5xf32> -> vector<8x5x5xf32>
    %cst_95 = arith.constant 0.353553385 : f32
    %285 = vector.broadcast %cst_95 : f32 to vector<8x5x5xf32>
    %286 = arith.mulf %284, %285 : vector<8x5x5xf32>
    %cst_96 = arith.constant dense<0xFF800000> : vector<8x5xf32>
    %287 = vector.multi_reduction <maximumf>, %286, %cst_96 [2] : vector<8x5x5xf32> to vector<8x5xf32>
    %288 = vector.shape_cast %287 : vector<8x5xf32> to vector<8x5x1xf32>
    %289 = vector.broadcast %288 : vector<8x5x1xf32> to vector<8x5x5xf32>
    %290 = arith.subf %286, %289 : vector<8x5x5xf32>
    %291 = math.exp %290 : vector<8x5x5xf32>
    %cst_97 = arith.constant dense<0.000000e+00> : vector<8x5xf32>
    %292 = vector.multi_reduction <add>, %291, %cst_97 [2] : vector<8x5x5xf32> to vector<8x5xf32>
    %293 = vector.shape_cast %292 : vector<8x5xf32> to vector<8x5x1xf32>
    %294 = tpu.reciprocal %293 {approx = true} : vector<8x5x1xf32> -> vector<8x5x1xf32>
    %295 = vector.broadcast %294 : vector<8x5x1xf32> to vector<8x5x5xf32>
    %296 = arith.mulf %291, %295 : vector<8x5x5xf32>
    %297 = arith.truncf %296 : vector<8x5x5xf32> to vector<8x5x5xbf16>
    %cst_98 = arith.constant dense<0.000000e+00> : vector<8x5x8xf32>
    %298 = tpu.matmul %297, %283, %cst_98 {dimension_numbers = #tpu.dot_dimension_numbers<[2], [1], [1], [2], [0, 0, 0, 1, 1, 2], [0], [0]>} : vector<8x5x5xbf16>, vector<8x5x8xbf16>, vector<8x5x8xf32> -> vector<8x5x8xf32>
    %299 = vector.extract_strided_slice %298 {offsets = [0, 0, 0], sizes = [1, 5, 8], strides = [1, 1, 1]} : vector<8x5x8xf32> to vector<1x5x8xf32>
    %300 = vector.shape_cast %299 : vector<1x5x8xf32> to vector<5x8xf32>
    %c0_99 = arith.constant 0 : index
    %c0_100 = arith.constant 0 : index
    %301 = vector.load %arg17[%c0_99, %c0_100] : memref<10x32xf32, #tpu.memory_space<vmem>>, vector<5x8xf32>
    tpu.vector_store %arg17[%c0_99, %c0_100], %300 {strides = array<i32>} : memref<10x32xf32, #tpu.memory_space<vmem>>, vector<5x8xf32>,
    %302 = vector.extract_strided_slice %298 {offsets = [1, 0, 0], sizes = [1, 5, 8], strides = [1, 1, 1]} : vector<8x5x8xf32> to vector<1x5x8xf32>
    %303 = vector.shape_cast %302 : vector<1x5x8xf32> to vector<5x8xf32>
    %c0_101 = arith.constant 0 : index
    %c8_102 = arith.constant 8 : index
    %304 = vector.load %arg17[%c0_101, %c8_102] : memref<10x32xf32, #tpu.memory_space<vmem>>, vector<5x8xf32>
    tpu.vector_store %arg17[%c0_101, %c8_102], %303 {strides = array<i32>} : memref<10x32xf32, #tpu.memory_space<vmem>>, vector<5x8xf32>,
    %305 = vector.extract_strided_slice %298 {offsets = [2, 0, 0], sizes = [1, 5, 8], strides = [1, 1, 1]} : vector<8x5x8xf32> to vector<1x5x8xf32>
    %306 = vector.shape_cast %305 : vector<1x5x8xf32> to vector<5x8xf32>
    %c0_103 = arith.constant 0 : index
    %c16_104 = arith.constant 16 : index
    %307 = vector.load %arg17[%c0_103, %c16_104] : memref<10x32xf32, #tpu.memory_space<vmem>>, vector<5x8xf32>
    tpu.vector_store %arg17[%c0_103, %c16_104], %306 {strides = array<i32>} : memref<10x32xf32, #tpu.memory_space<vmem>>, vector<5x8xf32>,
    %308 = vector.extract_strided_slice %298 {offsets = [3, 0, 0], sizes = [1, 5, 8], strides = [1, 1, 1]} : vector<8x5x8xf32> to vector<1x5x8xf32>
    %309 = vector.shape_cast %308 : vector<1x5x8xf32> to vector<5x8xf32>
    %c0_105 = arith.constant 0 : index
    %c24_106 = arith.constant 24 : index
    %310 = vector.load %arg17[%c0_105, %c24_106] : memref<10x32xf32, #tpu.memory_space<vmem>>, vector<5x8xf32>
    tpu.vector_store %arg17[%c0_105, %c24_106], %309 {strides = array<i32>} : memref<10x32xf32, #tpu.memory_space<vmem>>, vector<5x8xf32>,
    %311 = vector.extract_strided_slice %298 {offsets = [4, 0, 0], sizes = [1, 5, 8], strides = [1, 1, 1]} : vector<8x5x8xf32> to vector<1x5x8xf32>
    %312 = vector.shape_cast %311 : vector<1x5x8xf32> to vector<5x8xf32>
    %c5_107 = arith.constant 5 : index
    %c0_108 = arith.constant 0 : index
    %313 = vector.load %arg17[%c5_107, %c0_108] : memref<10x32xf32, #tpu.memory_space<vmem>>, vector<5x8xf32>
    tpu.vector_store %arg17[%c5_107, %c0_108], %312 {strides = array<i32>} : memref<10x32xf32, #tpu.memory_space<vmem>>, vector<5x8xf32>,
    %314 = vector.extract_strided_slice %298 {offsets = [5, 0, 0], sizes = [1, 5, 8], strides = [1, 1, 1]} : vector<8x5x8xf32> to vector<1x5x8xf32>
    %315 = vector.shape_cast %314 : vector<1x5x8xf32> to vector<5x8xf32>
    %c5_109 = arith.constant 5 : index
    %c8_110 = arith.constant 8 : index
    %316 = vector.load %arg17[%c5_109, %c8_110] : memref<10x32xf32, #tpu.memory_space<vmem>>, vector<5x8xf32>
    tpu.vector_store %arg17[%c5_109, %c8_110], %315 {strides = array<i32>} : memref<10x32xf32, #tpu.memory_space<vmem>>, vector<5x8xf32>,
    %317 = vector.extract_strided_slice %298 {offsets = [6, 0, 0], sizes = [1, 5, 8], strides = [1, 1, 1]} : vector<8x5x8xf32> to vector<1x5x8xf32>
    %318 = vector.shape_cast %317 : vector<1x5x8xf32> to vector<5x8xf32>
    %c5_111 = arith.constant 5 : index
    %c16_112 = arith.constant 16 : index
    %319 = vector.load %arg17[%c5_111, %c16_112] : memref<10x32xf32, #tpu.memory_space<vmem>>, vector<5x8xf32>
    tpu.vector_store %arg17[%c5_111, %c16_112], %318 {strides = array<i32>} : memref<10x32xf32, #tpu.memory_space<vmem>>, vector<5x8xf32>,
    %320 = vector.extract_strided_slice %298 {offsets = [7, 0, 0], sizes = [1, 5, 8], strides = [1, 1, 1]} : vector<8x5x8xf32> to vector<1x5x8xf32>
    %321 = vector.shape_cast %320 : vector<1x5x8xf32> to vector<5x8xf32>
    %c5_113 = arith.constant 5 : index
    %c24_114 = arith.constant 24 : index
    %322 = vector.load %arg17[%c5_113, %c24_114] : memref<10x32xf32, #tpu.memory_space<vmem>>, vector<5x8xf32>
    tpu.vector_store %arg17[%c5_113, %c24_114], %321 {strides = array<i32>} : memref<10x32xf32, #tpu.memory_space<vmem>>, vector<5x8xf32>,
    %c0_115 = arith.constant 0 : index
    %c0_116 = arith.constant 0 : index
    %323 = vector.load %arg17[%c0_115, %c0_116] : memref<10x32xf32, #tpu.memory_space<vmem>>, vector<10x32xf32>
    %324 = arith.truncf %323 : vector<10x32xf32> to vector<10x32xbf16>
    %c1_117 = arith.constant 1 : index
    %c0_118 = arith.constant 0 : index
    %c0_119 = arith.constant 0 : index
    %325 = vector.load %arg8[%c1_117, %c0_118, %c0_119] : memref<2x32x32xbf16, #tpu.memory_space<vmem>>, vector<1x32x32xbf16>
    %326 = vector.shape_cast %325 : vector<1x32x32xbf16> to vector<32x32xbf16>
    %cst_120 = arith.constant dense<0.000000e+00> : vector<10x32xf32>
    %327 = tpu.matmul %324, %326, %cst_120 {dimension_numbers = #tpu.dot_dimension_numbers<[1], [0], [0], [1], [0, 0, 1, 1], [], []>} : vector<10x32xbf16>, vector<32x32xbf16>, vector<10x32xf32> -> vector<10x32xf32>
    %c1_121 = arith.constant 1 : index
    %c0_122 = arith.constant 0 : index
    %c0_123 = arith.constant 0 : index
    %328 = vector.load %arg9[%c1_121, %c0_122, %c0_123] : memref<2x1x32xf32, #tpu.memory_space<vmem>>, vector<1x1x32xf32>
    %329 = vector.shape_cast %328 : vector<1x1x32xf32> to vector<1x32xf32>
    %330 = vector.broadcast %329 : vector<1x32xf32> to vector<10x32xf32>
    %331 = arith.addf %327, %330 : vector<10x32xf32>
    %332 = arith.addf %199, %331 : vector<10x32xf32>
    %c1_124 = arith.constant 1 : index
    %c0_125 = arith.constant 0 : index
    %c0_126 = arith.constant 0 : index
    %333 = vector.load %arg10[%c1_124, %c0_125, %c0_126] : memref<2x1x32xf32, #tpu.memory_space<vmem>>, vector<1x1x32xf32>
    %334 = vector.shape_cast %333 : vector<1x1x32xf32> to vector<1x32xf32>
    %c1_127 = arith.constant 1 : index
    %c0_128 = arith.constant 0 : index
    %c0_129 = arith.constant 0 : index
    %335 = vector.load %arg11[%c1_127, %c0_128, %c0_129] : memref<2x1x32xf32, #tpu.memory_space<vmem>>, vector<1x1x32xf32>
    %336 = vector.shape_cast %335 : vector<1x1x32xf32> to vector<1x32xf32>
    %cst_130 = arith.constant dense<0.000000e+00> : vector<10xf32>
    %337 = vector.multi_reduction <add>, %332, %cst_130 [1] : vector<10x32xf32> to vector<10xf32>
    %338 = vector.shape_cast %337 : vector<10xf32> to vector<10x1xf32>
    %cst_131 = arith.constant 3.200000e+01 : f32
    %339 = vector.broadcast %cst_131 : f32 to vector<10x1xf32>
    %340 = arith.divf %338, %339 : vector<10x1xf32>
    %341 = vector.broadcast %340 : vector<10x1xf32> to vector<10x32xf32>
    %342 = arith.subf %332, %341 : vector<10x32xf32>
    %343 = arith.mulf %342, %342 : vector<10x32xf32>
    %cst_132 = arith.constant dense<0.000000e+00> : vector<10xf32>
    %344 = vector.multi_reduction <add>, %343, %cst_132 [1] : vector<10x32xf32> to vector<10xf32>
    %345 = vector.shape_cast %344 : vector<10xf32> to vector<10x1xf32>
    %cst_133 = arith.constant 3.200000e+01 : f32
    %346 = vector.broadcast %cst_133 : f32 to vector<10x1xf32>
    %347 = arith.divf %345, %346 : vector<10x1xf32>
    %348 = vector.broadcast %340 : vector<10x1xf32> to vector<10x32xf32>
    %349 = arith.subf %332, %348 : vector<10x32xf32>
    %cst_134 = arith.constant 9.99999974E-6 : f32
    %350 = vector.broadcast %cst_134 : f32 to vector<10x1xf32>
    %351 = arith.addf %347, %350 : vector<10x1xf32>
    %352 = math.rsqrt %351 : vector<10x1xf32>
    %353 = vector.broadcast %352 : vector<10x1xf32> to vector<10x32xf32>
    %354 = arith.mulf %349, %353 : vector<10x32xf32>
    %355 = vector.broadcast %334 : vector<1x32xf32> to vector<10x32xf32>
    %356 = arith.mulf %354, %355 : vector<10x32xf32>
    %357 = vector.broadcast %336 : vector<1x32xf32> to vector<10x32xf32>
    %358 = arith.addf %356, %357 : vector<10x32xf32>
    %359 = arith.truncf %358 : vector<10x32xf32> to vector<10x32xbf16>
    %c1_135 = arith.constant 1 : index
    %c0_136 = arith.constant 0 : index
    %c0_137 = arith.constant 0 : index
    %360 = vector.load %arg12[%c1_135, %c0_136, %c0_137] : memref<2x32x64xbf16, #tpu.memory_space<vmem>>, vector<1x32x64xbf16>
    %361 = vector.shape_cast %360 : vector<1x32x64xbf16> to vector<32x64xbf16>
    %cst_138 = arith.constant dense<0.000000e+00> : vector<10x64xf32>
    %362 = tpu.matmul %359, %361, %cst_138 {dimension_numbers = #tpu.dot_dimension_numbers<[1], [0], [0], [1], [0, 0, 1, 1], [], []>} : vector<10x32xbf16>, vector<32x64xbf16>, vector<10x64xf32> -> vector<10x64xf32>
    %c1_139 = arith.constant 1 : index
    %c0_140 = arith.constant 0 : index
    %c0_141 = arith.constant 0 : index
    %363 = vector.load %arg13[%c1_139, %c0_140, %c0_141] : memref<2x1x64xf32, #tpu.memory_space<vmem>>, vector<1x1x64xf32>
    %364 = vector.shape_cast %363 : vector<1x1x64xf32> to vector<1x64xf32>
    %365 = vector.broadcast %364 : vector<1x64xf32> to vector<10x64xf32>
    %366 = arith.addf %362, %365 : vector<10x64xf32>
    %cst_142 = arith.constant 5.000000e-01 : f32
    %367 = vector.broadcast %cst_142 : f32 to vector<10x64xf32>
    %368 = arith.mulf %367, %366 : vector<10x64xf32>
    %cst_143 = arith.constant 0.707106769 : f32
    %369 = vector.broadcast %cst_143 : f32 to vector<10x64xf32>
    %370 = arith.mulf %366, %369 : vector<10x64xf32>
    %371 = math.erf %370 : vector<10x64xf32>
    %cst_144 = arith.constant 1.000000e+00 : f32
    %372 = vector.broadcast %cst_144 : f32 to vector<10x64xf32>
    %373 = arith.addf %372, %371 : vector<10x64xf32>
    %374 = arith.mulf %368, %373 : vector<10x64xf32>
    %375 = arith.truncf %374 : vector<10x64xf32> to vector<10x64xbf16>
    %c1_145 = arith.constant 1 : index
    %c0_146 = arith.constant 0 : index
    %c0_147 = arith.constant 0 : index
    %376 = vector.load %arg14[%c1_145, %c0_146, %c0_147] : memref<2x64x32xbf16, #tpu.memory_space<vmem>>, vector<1x64x32xbf16>
    %377 = vector.shape_cast %376 : vector<1x64x32xbf16> to vector<64x32xbf16>
    %cst_148 = arith.constant dense<0.000000e+00> : vector<10x32xf32>
    %378 = tpu.matmul %375, %377, %cst_148 {dimension_numbers = #tpu.dot_dimension_numbers<[1], [0], [0], [1], [0, 0, 1, 1], [], []>} : vector<10x64xbf16>, vector<64x32xbf16>, vector<10x32xf32> -> vector<10x32xf32>
    %c1_149 = arith.constant 1 : index
    %c0_150 = arith.constant 0 : index
    %c0_151 = arith.constant 0 : index
    %379 = vector.load %arg15[%c1_149, %c0_150, %c0_151] : memref<2x1x32xf32, #tpu.memory_space<vmem>>, vector<1x1x32xf32>
    %380 = vector.shape_cast %379 : vector<1x1x32xf32> to vector<1x32xf32>
    %381 = vector.broadcast %380 : vector<1x32xf32> to vector<10x32xf32>
    %382 = arith.addf %378, %381 : vector<10x32xf32>
    %383 = arith.addf %332, %382 : vector<10x32xf32>
    %384 = vector.extract_strided_slice %383 {offsets = [0, 0], sizes = [1, 32], strides = [1, 1]} : vector<10x32xf32> to vector<1x32xf32>
    %c0_152 = arith.constant 0 : index
    %c0_153 = arith.constant 0 : index
    %385 = vector.load %arg16[%c0_152, %c0_153] : memref<2x32xf32, #tpu.memory_space<vmem>>, vector<1x32xf32>
    tpu.vector_store %arg16[%c0_152, %c0_153], %384 {strides = array<i32>} : memref<2x32xf32, #tpu.memory_space<vmem>>, vector<1x32xf32>,
    %386 = vector.extract_strided_slice %383 {offsets = [5, 0], sizes = [1, 32], strides = [1, 1]} : vector<10x32xf32> to vector<1x32xf32>
    %c1_154 = arith.constant 1 : index
    %c0_155 = arith.constant 0 : index
    %387 = vector.load %arg16[%c1_154, %c0_155] : memref<2x32xf32, #tpu.memory_space<vmem>>, vector<1x32xf32>
    tpu.vector_store %arg16[%c1_154, %c0_155], %386 {strides = array<i32>} : memref<2x32xf32, #tpu.memory_space<vmem>>, vector<1x32xf32>,
    return
  }
}

</mosaic_0001>

<bundles_post_ra>
// kernel: forward.1
= control target key start
LH: loop header
LB: loop body
LE: loop exit
PB: predicated region body
PF: predicated region fallthrough
CT: control target
= control target key end

     0   :  { %s4213_s0 = inlined_call_operand.vmem [shape: f32[8,16], index: 0, kind: input, shape index: {}]   ;;  %s4214_s1 = inlined_call_operand.vmem [shape: bf16[16,32], index: 1, kind: input, shape index: {}]   ;;  %s4215_s2 = inlined_call_operand.vmem [shape: f32[1,32], index: 2, kind: input, shape index: {}]   ;;  %s4216_s3 = inlined_call_operand.vmem [shape: f32[1,32], index: 3, kind: input, shape index: {}]   ;;  %s4217_s4 = inlined_call_operand.vmem [shape: f32[5,32], index: 4, kind: input, shape index: {}]   ;;  %s4218_s5 = inlined_call_operand.vmem [shape: f32[2,1,32], index: 5, kind: input, shape index: {}]   ;;  %s4219_s6 = inlined_call_operand.vmem [shape: f32[2,1,32], index: 6, kind: input, shape index: {}]   ;;  %s4220_s7 = inlined_call_operand.vmem [shape: bf16[2,32,96], index: 7, kind: input, shape index: {}]   ;;  %s4221_s8 = inlined_call_operand.vmem [shape: bf16[2,32,32], index: 8, kind: input, shape index: {}]   ;;  %s4222_s9 = inlined_call_operand.vmem [shape: f32[2,1,32], index: 9, kind: input, shape index: {}]   ;;  %s4223_s10 = inlined_call_operand.vmem [shape: f32[2,1,32], index: 10, kind: input, shape index: {}]   ;;  %s4224_s11 = inlined_call_operand.vmem [shape: f32[2,1,32], index: 11, kind: input, shape index: {}]   ;;  %s4225_s12 = inlined_call_operand.vmem [shape: bf16[2,32,64], index: 12, kind: input, shape index: {}]   ;;  %s4226_s13 = inlined_call_operand.vmem [shape: f32[2,1,64], index: 13, kind: input, shape index: {}]   ;;  %s4227_s14 = inlined_call_operand.vmem [shape: bf16[2,64,32], index: 14, kind: input, shape index: {}]   ;;  %s4228_s15 = inlined_call_operand.vmem [shape: f32[2,1,32], index: 15, kind: input, shape index: {}]   ;;  %s4229_s16 = inlined_call_operand.hbm [shape: f32[2,32], index: 16, kind: output, shape index: {}]  }
   0x1   :  { %4230 = sst [smem:[#allocation6_spill]] %s4213_s0 }
   0x2   :  { %v3323_v0 = vld [vmem:[%s4214_s1] sm:$0xff]   ;;  %v3456_v1 = vmov 0.0   ;;  %s4231_s25 = sld [smem:[#allocation6_spill]]  ;;  %vm72_vm0 = vcmask 130048   ;;  %vm3457_vm1 = vmmov 0  }
   0x3   :  { %3041 = vmatprep.subr.bf16.mxu0 %v3456_v1  ;;  %3061 = vmatprep.subr.bf16.mxu1 %v3456_v1 }
   0x4   :  { %3042 = vmatpush3.bf16.msra.mxu0 %v3323_v0  ;;  %3043 = vmatprep.mubr.msk.bf16.mxu0 %vm3457_vm1, %v3456_v1 }
   0x5   :  { %3047 = vmatprep.subr.bf16.mxu0 %v3456_v1  ;;  %3063 = vmatprep.mubr.msk.bf16.mxu1 %vm3457_vm1, %v3456_v1 }
   0x8   :  { %v55_v2 = vld [vmem:[%s4231_s25] sm:$0xff] }
   0x9   :  { %v56_v3 = vpack.c.bf16 %v55_v2, %v55_v2 }
   0xb   :  { %3044 = vmatmul.mubr.msk.bf16.vlgmr.msra.gmra.mrb[0].mxu0 %vm72_vm0, %v56_v3 }
   0xc   :  { %3051 = vmatprep.mubr.msk.bf16.mxu0 %vm3457_vm1, %v3456_v1 }
   0xd   :  { %21 = vsyncpa [#allocation4], 0  ;;  %v129_v4 = vlaneseq  ;;  %v119_v5 = vld [vmem:[%s4217_s4 + $0x1] sm:$0xf]  ;;  %v116_v7 = vld [vmem:[%s4216_s3] sm:$0x1] }
   0xe   :  { %v117_v8 = vld [vmem:[%s4217_s4] sm:$0x1]  ;;  %v122_v10 = vrot.slane %v119_v5, 4  ;;  %vm137_vm2 = vcmask 1040384   ;;  %vm139_vm3 = vcmask 1044480   ;;  %vm141_vm4 = vcmask 1045504  }
   0xf   :  { %v130_v6 = vshrl.u32 %v129_v4, 7  ;;  %v2843_v9 = vld [vmem:[%s4215_s2] ss:$0 sm:$0xff]  ;;  %v118_v12 = vadd.f32 %v117_v8, %v116_v7  ;;  %vm145_vm5 = vcmask 261120   ;;  %vm149_vm6 = vcmask 254976   ;;  %v3325_v39 = vld [vmem:[%s4220_s7 + $0x8] sm:$0xff]  }
  0x10   :  { %v3324_v38 = vld [vmem:[%s4220_s7] sm:$0xff]   ;;  %s3458_s23 = smov 112   ;;  %s3459_s24 = smov 120   ;;  %vm262_vm7 = vcmask 1042432   ;;  %vm287_vm8 = vcmask 64512   ;;  %vm685_vm9 = vcmask 36864  }
  0x11   :  { %v131_v13 = vsub.s32 0, %v130_v6  ;;  %3048 = vmatpush3.bf16.msra.mxu0 %v3324_v38  ;;  %v2846_v48 = vld [vmem:[%s4218_s5] ss:$0 sm:$0xff]  ;;  %s3460_s25 = smov 104   ;;  %s3461_s1 = smov 96   ;;  %vm788_vm10 = vcmask 1041408  }
  0x12   :  { %3049 = vmatprep.subr.bf16.mxu0 %v3456_v1  ;;  %v2847_v52 = vld [vmem:[%s4219_s6] ss:$0 sm:$0xff]  ;;  %s3462_s26 = smov 64   ;;  %vm784_vm11 = vcmask 39936   ;;  %vm1170_vm12 = vcmask 61440   ;;  %s3464_s27 = smov 8  }
  0x13   :  { %v132_v20 = vrot.slane %v118_v12, %v131_v13  ;;  %s3465_s28 = smov 16   ;;  %s3466_s29 = smov 24   ;;  %vm1176_vm13 = vcmask 127040   ;;  %vm1182_vm14 = vcmask 192640   ;;  %vm1188_vm15 = vcmask 258240  }
  0x14   :  { %vm1440_vm0 = vcmask 523264   ;;  %s3467_s21 = smov [#allocation3]  }
  0x15   :  { %3050 = vmatpush3.bf16.msra.mxu0 %v3325_v39 }
  0x16   :  { %3055 = vmatprep.subr.bf16.mxu0 %v3456_v1 }
  0xde   :  { %v110_v11 = vpop.f32.mrb[0].mxu0 }
  0xdf   :  { %v111_v14 = vadd.f32 %v2843_v9, %v110_v11  ;;  %v3045_v15 = vpop.f32.mrb[1].mxu0 }
  0xe0   :  { %v113_v16 = vpop.f32.mrb[2].mxu0 }
  0xe1   :  { %v120_v17 = vadd.f32 %v119_v5, %v111_v14  ;;  %v124_v18 = vadd.f32 %v122_v10, %v111_v14  ;;  %v3046_v19 = vpop.f32.mrb[3].mxu0 }
  0xe3   :  { %v126_v21 = vrot.slane %v120_v17, 7  ;;  %v3580_v22 = vrot.slane %v124_v18, 6 }
  0xe5   :  { %v138_v23 = vsel %vm137_vm2, %v118_v12, %v126_v21  ;;  %v150_v27 = vsel %vm149_vm6, %v3580_v22, 0.0  ;;  %vm2827_vm2 = vcmask 259077  }
  0xe6   :  { %v140_v24 = vsel %vm139_vm3, %v138_v23, %v132_v20 }
  0xe7   :  { %v3583_v25 = vsel %vm141_vm4, %v140_v24, %v3580_v22 }
  0xe8   :  { %v146_v26 = vsel %vm145_vm5, %v3583_v25, 0.0 }
  0xe9   :  { %147 = vadd.xlane.f32.xlu0 %v146_v26 }
  0xed   :  { %151 = vadd.xlane.f32.xlu0 %v150_v27 }
 0x176   :  { %v148_v28 = vpop.xlane.xlu0 %147 }
 0x177   :  { %v154_v29 = vmul.f32 0.03125, %v148_v28 }
 0x179   :  { %v156_v30 = vsub.f32 %v3583_v25, %v154_v29 }
 0x17a   :  { %v152_v31 = vpop.xlane.xlu0 %151 }
 0x17b   :  { %v155_v32 = vmul.f32 0.03125, %v152_v31  ;;  %v158_v33 = vmul.f32 %v156_v30, %v156_v30 }
 0x17d   :  { %v157_v34 = vsub.f32 %v3580_v22, %v155_v32  ;;  %v160_v35 = vsel %vm145_vm5, %v158_v33, 0.0 }
 0x17e   :  { %161 = vadd.xlane.f32.xlu1 %v160_v35 }
 0x17f   :  { %v159_v36 = vmul.f32 %v157_v34, %v157_v34 }
 0x181   :  { %v163_v37 = vsel %vm149_vm6, %v159_v36, 0.0 }
 0x182   :  { %164 = vadd.xlane.f32.xlu1 %v163_v37 }
 0x20b   :  { %v162_v40 = vpop.xlane.xlu1 %161 }
 0x20c   :  { %v166_v41 = vmul.f32 0.03125, %v162_v40 }
 0x20e   :  { %v168_v42 = vadd.f32 1e-05, %v166_v41 }
 0x20f   :  { %v165_v43 = vpop.xlane.xlu1 %164 }
 0x210   :  { %3344 = vrsqrt.f32 %v168_v42  ;;  %v167_v44 = vmul.f32 0.03125, %v165_v43 }
 0x212   :  { %v169_v45 = vadd.f32 1e-05, %v167_v44 }
 0x214   :  { %3346 = vrsqrt.f32 %v169_v45 }
 0x21a   :  { %v3345_v46 = vpop.eup %3344 }
 0x21b   :  { %v172_v47 = vmul.f32 %v3345_v46, %v156_v30 }
 0x21d   :  { %v180_v50 = vmul.f32 %v2846_v48, %v172_v47 }
 0x21e   :  { %v3347_v49 = vpop.eup %3346 }
 0x21f   :  { %v173_v51 = vmul.f32 %v3347_v49, %v157_v34  ;;  %v188_v54 = vadd.f32 %v2847_v52, %v180_v50 }
 0x221   :  { %v181_v53 = vmul.f32 %v2846_v48, %v173_v51 }
 0x223   :  { %v189_v55 = vadd.f32 %v2847_v52, %v181_v53 }
 0x225   :  { %v190_v56 = vpack.c.bf16 %v189_v55, %v188_v54 }
 0x227   :  { %3052 = vmatmul.mubr.msk.bf16.vlgmr.msra.gmra.mrb[4].mxu0 %vm145_vm5, %v190_v56 }
 0x228   :  { %3057 = vmatprep.mubr.msk.bf16.mxu0 %vm3457_vm1, %v3456_v1 }
 0x2fa   :  { %v244_v57 = vpop.f32.mrb[4].mxu0 }
 0x2fb   :  { %255 = vrot.lane.b32.xlu1 %v244_v57, %s3458_s23  ;;  %252 = vrot.lane.b32.xlu0 %v244_v57, %s3459_s24  ;;  %v3053_v58 = vpop.f32.mrb[5].mxu0  ;;  %v263_v62 = vrot.slane %v244_v57, 5  ;;  %v3615_v0 = vpack.c.bf16 %v244_v57, %v244_v57 }
 0x2fc   :  { %v247_v59 = vpop.f32.mrb[6].mxu0 }
 0x2fd   :  { %v264_v60 = vrot.slane %v247_v59, 5  ;;  %v3054_v61 = vpop.f32.mrb[7].mxu0 }
 0x2ff   :  { %258 = vrot.lane.b32.xlu1 %v244_v57, %s3460_s25  ;;  %v265_v63 = vsel %vm262_vm7, %v263_v62, %v264_v60 }
 0x300   :  { %270 = vrot.lane.b32.xlu0 %v265_v63, %s3458_s23  ;;  %v3631_v9 = vpack.c.bf16 %v265_v63, %v265_v63 }
 0x303   :  { %267 = vrot.lane.b32.xlu1 %v265_v63, %s3459_s24 }
 0x304   :  { %285 = vrot.lane.b32.xlu0 %v3615_v0, %s3461_s1 }
 0x307   :  { %273 = vrot.lane.b32.xlu1 %v265_v63, %s3460_s25 }
 0x36d   :  { %v256_v2 = vpop.permute.xlu1 %255  ;;  %v253_v3 = vpop.permute.xlu0 %252 }
 0x36e   :  { %v3621_v4 = vpack.c.bf16 %v256_v2, %v256_v2  ;;  %v3623_v5 = vpack.c.bf16 %v253_v3, %v253_v3 }
 0x370   :  { %384 = vrot.lane.b32.xlu0 %v3621_v4, %s3461_s1  ;;  %335 = vrot.lane.b32.xlu1 %v3623_v5, %s3461_s1 }
 0x371   :  { %v259_v6 = vpop.permute.xlu1 %258 }
 0x372   :  { %v3629_v7 = vpack.c.bf16 %v259_v6, %v259_v6  ;;  %v271_v8 = vpop.permute.xlu0 %270 }
 0x373   :  { %v3639_v13 = vpack.c.bf16 %v271_v8, %v271_v8 }
 0x374   :  { %433 = vrot.lane.b32.xlu1 %v3629_v7, %s3461_s1  ;;  %482 = vrot.lane.b32.xlu0 %v3631_v9, %s3461_s1 }
 0x375   :  { %v268_v10 = vpop.permute.xlu1 %267 }
 0x376   :  { %v3637_v11 = vpack.c.bf16 %v268_v10, %v268_v10  ;;  %v286_v12 = vpop.permute.xlu0 %285 }
 0x377   :  { %v292_v14 = vsel %vm287_vm8, %v286_v12, 0 }
 0x378   :  { %3056 = vmatpush3.bf16.xpose.msra.mxu0 %v292_v14  ;;  %531 = vrot.lane.b32.xlu1 %v3637_v11, %s3461_s1 }
 0x379   :  { %580 = vrot.lane.b32.xlu0 %v3639_v13, %s3461_s1  ;;  %v274_v15 = vpop.permute.xlu1 %273  ;;  %3067 = vmatprep.subr.bf16.mxu0 %v3456_v1 }
 0x37a   :  { %v3647_v16 = vpack.c.bf16 %v274_v15, %v274_v15 }
 0x37c   :  { %629 = vrot.lane.b32.xlu1 %v3647_v16, %s3461_s1 }
 0x37f   :  { %3058 = vmatmul.mubr.msk.bf16.vlgmr.msra.gmra.mrb[8].mxu0 %vm287_vm8, %v3615_v0 }
 0x380   :  { %3069 = vmatprep.mubr.msk.bf16.mxu0 %vm3457_vm1, %v3456_v1 }
 0x3e2   :  { %v385_v17 = vpop.permute.xlu0 %384  ;;  %v336_v18 = vpop.permute.xlu1 %335 }
 0x3e3   :  { %v390_v19 = vsel %vm287_vm8, %v385_v17, 0  ;;  %v341_v20 = vsel %vm287_vm8, %v336_v18, 0 }
 0x3e4   :  { %3062 = vmatpush3.bf16.xpose.msra.mxu1 %v341_v20  ;;  %3068 = vmatpush3.bf16.xpose.msra.mxu0 %v390_v19 }
 0x3e5   :  { %3073 = vmatprep.subr.bf16.mxu1 %v3456_v1  ;;  %3079 = vmatprep.subr.bf16.mxu0 %v3456_v1 }
 0x3e6   :  { %v434_v21 = vpop.permute.xlu1 %433  ;;  %v483_v23 = vpop.permute.xlu0 %482 }
 0x3e7   :  { %v439_v24 = vsel %vm287_vm8, %v434_v21, 0  ;;  %v488_v26 = vsel %vm287_vm8, %v483_v23, 0 }
 0x3ea   :  { %v532_v27 = vpop.permute.xlu1 %531 }
 0x3eb   :  { %3064 = vmatmul.mubr.msk.bf16.vlgmr.msra.gmra.mrb[0].mxu1 %vm287_vm8, %v3623_v5  ;;  %3070 = vmatmul.mubr.msk.bf16.vlgmr.msra.gmra.mrb[12].mxu0 %vm287_vm8, %v3621_v4  ;;  %v581_v28 = vpop.permute.xlu0 %580  ;;  %v537_v29 = vsel %vm287_vm8, %v532_v27, 0 }
 0x3ec   :  { %3074 = vmatpush3.bf16.xpose.msra.mxu1 %v439_v24  ;;  %3080 = vmatpush3.bf16.xpose.msra.mxu0 %v488_v26  ;;  %v586_v30 = vsel %vm287_vm8, %v581_v28, 0 }
 0x3ed   :  { %3075 = vmatprep.mubr.msk.bf16.mxu1 %vm3457_vm1, %v3456_v1  ;;  %3081 = vmatprep.mubr.msk.bf16.mxu0 %vm3457_vm1, %v3456_v1 }
 0x3ee   :  { %3085 = vmatprep.subr.bf16.mxu1 %v3456_v1  ;;  %3091 = vmatprep.subr.bf16.mxu0 %v3456_v1  ;;  %v630_v31 = vpop.permute.xlu1 %629 }
 0x3ef   :  { %v635_v32 = vsel %vm287_vm8, %v630_v31, 0 }
 0x3f3   :  { %3076 = vmatmul.mubr.msk.bf16.vlgmr.msra.gmra.mrb[4].mxu1 %vm287_vm8, %v3629_v7  ;;  %3082 = vmatmul.mubr.msk.bf16.vlgmr.msra.gmra.mrb[16].mxu0 %vm287_vm8, %v3631_v9 }
 0x3f4   :  { %3086 = vmatpush3.bf16.xpose.msra.mxu1 %v537_v29  ;;  %3092 = vmatpush3.bf16.xpose.msra.mxu0 %v586_v30 }
 0x3f5   :  { %3087 = vmatprep.mubr.msk.bf16.mxu1 %vm3457_vm1, %v3456_v1  ;;  %3093 = vmatprep.mubr.msk.bf16.mxu0 %vm3457_vm1, %v3456_v1 }
 0x3f6   :  { %3097 = vmatprep.subr.bf16.mxu1 %v3456_v1  ;;  %3103 = vmatprep.subr.bf16.mxu0 %v3456_v1 }
 0x3fb   :  { %3088 = vmatmul.mubr.msk.bf16.vlgmr.msra.gmra.mrb[8].mxu1 %vm287_vm8, %v3637_v11  ;;  %3094 = vmatmul.mubr.msk.bf16.vlgmr.msra.gmra.mrb[20].mxu0 %vm287_vm8, %v3639_v13 }
 0x3fc   :  { %3098 = vmatpush3.bf16.xpose.msra.mxu1 %v635_v32  ;;  %3099 = vmatprep.mubr.msk.bf16.mxu1 %vm3457_vm1, %v3456_v1 }
 0x3fd   :  { %3109 = vmatprep.subr.bf16.mxu1 %v3456_v1  ;;  %3105 = vmatprep.mubr.msk.bf16.mxu0 %vm3457_vm1, %v3456_v1 }
 0x403   :  { %3100 = vmatmul.mubr.msk.bf16.vlgmr.msra.gmra.mrb[12].mxu1 %vm287_vm8, %v3647_v16 }
 0x404   :  { %3111 = vmatprep.mubr.msk.bf16.mxu1 %vm3457_vm1, %v3456_v1 }
 0x452   :  { %v328_v33 = vpop.f32.mrb[8].mxu0 }
 0x453   :  { %v677_v34 = vmul.f32 0.35355338, %v328_v33  ;;  %v3059_v35 = vpop.f32.mrb[9].mxu0 }
 0x454   :  { %v331_v36 = vpop.f32.mrb[10].mxu0 }
 0x455   :  { %v3060_v37 = vpop.f32.mrb[11].mxu0  ;;  %v686_v38 = vsel %vm685_vm9, %v677_v34, -inf }
 0x456   :  { %687 = vmax.xlane.f32.xlu0 %v686_v38 }
 0x4be   :  { %v377_v39 = vpop.f32.mrb[0].mxu1  ;;  %v426_v40 = vpop.f32.mrb[12].mxu0 }
 0x4bf   :  { %v3698_v41 = vmul.f32 0.35355338, %v377_v39  ;;  %v3700_v42 = vmul.f32 0.35355338, %v426_v40  ;;  %v3065_v43 = vpop.f32.mrb[1].mxu1  ;;  %v3071_v44 = vpop.f32.mrb[13].mxu0 }
 0x4c0   :  { %v380_v45 = vpop.f32.mrb[2].mxu1  ;;  %v429_v46 = vpop.f32.mrb[14].mxu0 }
 0x4c1   :  { %v3066_v47 = vpop.f32.mrb[3].mxu1  ;;  %v3072_v48 = vpop.f32.mrb[15].mxu0  ;;  %v689_v49 = vsel %vm685_vm9, %v3698_v41, -inf  ;;  %v692_v50 = vsel %vm685_vm9, %v3700_v42, -inf }
 0x4c2   :  { %690 = vmax.xlane.f32.xlu1 %v689_v49  ;;  %693 = vmax.xlane.f32.xlu0 %v692_v50 }
 0x4c6   :  { %v475_v51 = vpop.f32.mrb[4].mxu1  ;;  %v524_v52 = vpop.f32.mrb[16].mxu0 }
 0x4c7   :  { %v3706_v53 = vmul.f32 0.35355338, %v475_v51  ;;  %v3077_v54 = vpop.f32.mrb[5].mxu1  ;;  %v3083_v55 = vpop.f32.mrb[17].mxu0  ;;  %v681_v58 = vmul.f32 0.35355338, %v524_v52 }
 0x4c8   :  { %v478_v56 = vpop.f32.mrb[6].mxu1  ;;  %v527_v57 = vpop.f32.mrb[18].mxu0 }
 0x4c9   :  { %v3078_v59 = vpop.f32.mrb[7].mxu1  ;;  %v3084_v60 = vpop.f32.mrb[19].mxu0  ;;  %v695_v61 = vsel %vm685_vm9, %v3706_v53, -inf  ;;  %v698_v62 = vsel %vm685_vm9, %v681_v58, -inf }
 0x4ca   :  { %696 = vmax.xlane.f32.xlu0 %v695_v61 }
 0x4ce   :  { %v573_v63 = vpop.f32.mrb[8].mxu1  ;;  %699 = vmax.xlane.f32.xlu0 %v698_v62  ;;  %v622_v2 = vpop.f32.mrb[20].mxu0 }
 0x4cf   :  { %v3711_v3 = vmul.f32 0.35355338, %v573_v63  ;;  %v683_v6 = vmul.f32 0.35355338, %v622_v2  ;;  %v3089_v8 = vpop.f32.mrb[9].mxu1  ;;  %v3095_v10 = vpop.f32.mrb[21].mxu0 }
 0x4d0   :  { %v576_v12 = vpop.f32.mrb[10].mxu1  ;;  %v625_v14 = vpop.f32.mrb[22].mxu0 }
 0x4d1   :  { %v3090_v15 = vpop.f32.mrb[11].mxu1  ;;  %v3096_v17 = vpop.f32.mrb[23].mxu0  ;;  %v701_v18 = vsel %vm685_vm9, %v3711_v3, -inf  ;;  %v704_v19 = vsel %vm685_vm9, %v683_v6, -inf }
 0x4d2   :  { %702 = vmax.xlane.f32.xlu1 %v701_v18  ;;  %705 = vmax.xlane.f32.xlu0 %v704_v19 }
 0x4d6   :  { %v671_v20 = vpop.f32.mrb[12].mxu1 }
 0x4d7   :  { %v3101_v21 = vpop.f32.mrb[13].mxu1  ;;  %v3719_v31 = vmul.f32 0.35355338, %v671_v20 }
 0x4d8   :  { %v674_v23 = vpop.f32.mrb[14].mxu1 }
 0x4d9   :  { %v3102_v24 = vpop.f32.mrb[15].mxu1  ;;  %v707_v32 = vsel %vm685_vm9, %v3719_v31, -inf }
 0x4e3   :  { %782 = vrot.lane.b32.xlu1 %v3615_v0, %s3462_s26  ;;  %v688_v26 = vpop.xlane.xlu0 %687 }
 0x4e4   :  { %v710_v27 = vsub.f32 %v677_v34, %v688_v26 }
 0x4e6   :  { %v718_v28 = vmul.f32 1.442695, %v710_v27 }
 0x4e8   :  { %3348 = vpow2.f32 %v718_v28 }
 0x4f2   :  { %v3349_v29 = vpop.eup %3348 }
 0x4f3   :  { %v734_v30 = vsel %vm685_vm9, %v3349_v29, 0.0 }
 0x4f4   :  { %735 = vadd.xlane.f32.xlu0 %v734_v30 }
 0x507   :  { %708 = vmax.xlane.f32.xlu1 %v707_v32 }
 0x50a   :  { %834 = vrot.lane.b32.xlu0 %v3623_v5, %s3462_s26 }
 0x518   :  { %882 = vrot.lane.b32.xlu1 %v3621_v4, %s3462_s26 }
 0x51c   :  { %930 = vrot.lane.b32.xlu1 %v3629_v7, %s3462_s26  ;;  %v3463_v7 = vmov 65535  }
 0x51d   :  { %v789_v40 = vsel %vm788_vm10, 4294967295, %v3463_v7 }
 0x51e   :  { %v3742_v47 = vsel %vm262_vm7, %v789_v40, 0 }
 0x520   :  { %978 = vrot.lane.b32.xlu1 %v3631_v9, %s3462_s26 }
 0x54f   :  { %v691_v0 = vpop.xlane.xlu1 %690  ;;  %v694_v33 = vpop.xlane.xlu0 %693 }
 0x550   :  { %v711_v34 = vsub.f32 %v3698_v41, %v691_v0  ;;  %v712_v35 = vsub.f32 %v3700_v42, %v694_v33 }
 0x552   :  { %v720_v36 = vmul.f32 1.442695, %v711_v34  ;;  %v722_v37 = vmul.f32 1.442695, %v712_v35 }
 0x554   :  { %3350 = vpow2.f32 %v720_v36 }
 0x555   :  { %3352 = vpow2.f32 %v722_v37 }
 0x557   :  { %v697_v5 = vpop.xlane.xlu0 %696 }
 0x558   :  { %v713_v56 = vsub.f32 %v3706_v53, %v697_v5 }
 0x55b   :  { %v700_v38 = vpop.xlane.xlu0 %699 }
 0x55c   :  { %v714_v4 = vsub.f32 %v681_v58, %v700_v38  ;;  %v724_v58 = vmul.f32 1.442695, %v713_v56 }
 0x55e   :  { %v3733_v39 = vpop.eup %3350  ;;  %v726_v43 = vmul.f32 1.442695, %v714_v4 }
 0x55f   :  { %v3735_v9 = vpop.eup %3352  ;;  %v703_v44 = vpop.xlane.xlu1 %702  ;;  %v737_v41 = vsel %vm685_vm9, %v3733_v39, 0.0 }
 0x560   :  { %v706_v45 = vpop.xlane.xlu0 %705  ;;  %3354 = vpow2.f32 %v726_v43  ;;  %738 = vadd.xlane.f32.xlu1 %v737_v41  ;;  %v740_v46 = vsel %vm685_vm9, %v3735_v9, 0.0  ;;  %v715_v59 = vsub.f32 %v3711_v3, %v703_v44 }
 0x561   :  { %v716_v42 = vsub.f32 %v683_v6, %v706_v45  ;;  %741 = vadd.xlane.f32.xlu0 %v740_v46 }
 0x562   :  { %v728_v62 = vmul.f32 1.442695, %v715_v59 }
 0x563   :  { %v730_v48 = vmul.f32 1.442695, %v716_v42  ;;  %v783_v49 = vpop.permute.xlu1 %782 }
 0x564   :  { %v792_v50 = vand.u32 %v3742_v47, %v783_v49 }
 0x565   :  { %3356 = vpow2.f32 %v730_v48 }
 0x566   :  { %3104 = vmatpush3.bf16.msra.mxu0 %v792_v50 }
 0x567   :  { %3115 = vmatprep.subr.bf16.mxu0 %v3456_v1 }
 0x56a   :  { %v3746_v51 = vpop.eup %3354 }
 0x56b   :  { %v746_v52 = vsel %vm685_vm9, %v3746_v51, 0.0 }
 0x56c   :  { %747 = vadd.xlane.f32.xlu0 %v746_v52 }
 0x56f   :  { %v3750_v54 = vpop.eup %3356 }
 0x570   :  { %v752_v55 = vsel %vm685_vm9, %v3750_v54, 0.0 }
 0x571   :  { %753 = vadd.xlane.f32.xlu0 %v752_v55  ;;  %1026 = vrot.lane.b32.xlu1 %v3637_v11, %s3462_s26 }
 0x581   :  { %v736_v57 = vpop.xlane.xlu0 %735 }
 0x582   :  { %3358 = vrcp.f32 %v736_v57 }
 0x583   :  { %3360 = vpow2.f32 %v724_v58 }
 0x584   :  { %3362 = vpow2.f32 %v728_v62 }
 0x585   :  { %v835_v60 = vpop.permute.xlu0 %834 }
 0x586   :  { %v840_v61 = vand.u32 %v835_v60, %v3742_v47 }
 0x588   :  { %3110 = vmatpush3.bf16.msra.mxu1 %v840_v61 }
 0x589   :  { %3121 = vmatprep.subr.bf16.mxu1 %v3456_v1 }
 0x58c   :  { %v3359_v63 = vpop.eup %3358 }
 0x58d   :  { %v766_v2 = vmul.f32 %v3359_v63, %v3349_v29  ;;  %v3361_v6 = vpop.eup %3360 }
 0x58e   :  { %v743_v3 = vsel %vm685_vm9, %v3361_v6, 0.0  ;;  %v3764_v8 = vpop.eup %3362 }
 0x58f   :  { %v774_v11 = vpack.c.bf16 %v766_v2, %v766_v2  ;;  %v749_v15 = vsel %vm685_vm9, %v3764_v8, 0.0 }
 0x591   :  { %3106 = vmatmul.mubr.msk.bf16.vlgmr.msra.gmra.mrb[24].mxu0 %vm784_vm11, %v774_v11 }
 0x592   :  { %3117 = vmatprep.mubr.msk.bf16.mxu0 %vm3457_vm1, %v3456_v1 }
 0x594   :  { %v709_v53 = vpop.xlane.xlu1 %708 }
 0x595   :  { %v717_v10 = vsub.f32 %v3719_v31, %v709_v53  ;;  %744 = vadd.xlane.f32.xlu1 %v743_v3 }
 0x597   :  { %v732_v12 = vmul.f32 1.442695, %v717_v10 }
 0x598   :  { %v883_v14 = vpop.permute.xlu1 %882 }
 0x599   :  { %3364 = vpow2.f32 %v732_v12  ;;  %v888_v17 = vand.u32 %v883_v14, %v3742_v47  ;;  %750 = vadd.xlane.f32.xlu1 %v749_v15 }
 0x59b   :  { %3116 = vmatpush3.bf16.msra.mxu0 %v888_v17 }
 0x59c   :  { %3127 = vmatprep.subr.bf16.mxu0 %v3456_v1  ;;  %v931_v20 = vpop.permute.xlu1 %930 }
 0x5a0   :  { %v979_v21 = vpop.permute.xlu1 %978 }
 0x5a3   :  { %v3771_v18 = vpop.eup %3364 }
 0x5a4   :  { %v755_v19 = vsel %vm685_vm9, %v3771_v18, 0.0 }
 0x5a5   :  { %756 = vadd.xlane.f32.xlu0 %v755_v19  ;;  %v3327_v19 = vld [vmem:[%s4221_s8 + $0x8] sm:$0xff]  }
 0x5aa   :  { %1122 = vrot.lane.b32.xlu1 %v3647_v16, %s3462_s26  ;;  %v936_v16 = vand.u32 %v931_v20, %v3742_v47 }
 0x5bb   :  { %1074 = vrot.lane.b32.xlu0 %v3639_v13, %s3462_s26  ;;  %v984_v13 = vand.u32 %v979_v21, %v3742_v47 }
 0x5ed   :  { %v739_v23 = vpop.xlane.xlu1 %738 }
 0x5ee   :  { %3366 = vrcp.f32 %v739_v23  ;;  %v742_v24 = vpop.xlane.xlu0 %741 }
 0x5ef   :  { %3368 = vrcp.f32 %v742_v24 }
 0x5f1   :  { %v1027_v35 = vpop.permute.xlu1 %1026 }
 0x5f2   :  { %v1032_v40 = vand.u32 %v1027_v35, %v3742_v47 }
 0x5f8   :  { %v3367_v26 = vpop.eup %3366 }
 0x5f9   :  { %v3369_v27 = vpop.eup %3368  ;;  %v767_v28 = vmul.f32 %v3367_v26, %v3733_v39  ;;  %v748_v29 = vpop.xlane.xlu0 %747 }
 0x5fa   :  { %v768_v30 = vmul.f32 %v3369_v27, %v3735_v9  ;;  %3370 = vrcp.f32 %v748_v29 }
 0x5fb   :  { %v775_v31 = vpack.c.bf16 %v767_v28, %v767_v28 }
 0x5fc   :  { %v776_v32 = vpack.c.bf16 %v768_v30, %v768_v30 }
 0x5fd   :  { %3112 = vmatmul.mubr.msk.bf16.vlgmr.msra.gmra.mrb[16].mxu1 %vm784_vm11, %v775_v31 }
 0x5fe   :  { %3118 = vmatmul.mubr.msk.bf16.vlgmr.msra.gmra.mrb[28].mxu0 %vm784_vm11, %v776_v32  ;;  %3122 = vmatpush3.bf16.msra.mxu1 %v936_v16  ;;  %v754_v37 = vpop.xlane.xlu0 %753 }
 0x5ff   :  { %3128 = vmatpush3.bf16.msra.mxu0 %v984_v13  ;;  %3129 = vmatprep.mubr.msk.bf16.mxu0 %vm3457_vm1, %v3456_v1 }
 0x600   :  { %3123 = vmatprep.mubr.msk.bf16.mxu1 %vm3457_vm1, %v3456_v1  ;;  %3133 = vmatprep.subr.bf16.mxu1 %v3456_v1 }
 0x601   :  { %3139 = vmatprep.subr.bf16.mxu0 %v3456_v1 }
 0x604   :  { %v3371_v0 = vpop.eup %3370 }
 0x605   :  { %v770_v33 = vmul.f32 %v3371_v0, %v3746_v51 }
 0x607   :  { %v778_v34 = vpack.c.bf16 %v770_v33, %v770_v33 }
 0x609   :  { %3130 = vmatmul.mubr.msk.bf16.vlgmr.msra.gmra.mrb[32].mxu0 %vm784_vm11, %v778_v34 }
 0x60a   :  { %3141 = vmatprep.mubr.msk.bf16.mxu0 %vm3457_vm1, %v3456_v1 }
 0x622   :  { %v745_v36 = vpop.xlane.xlu1 %744 }
 0x623   :  { %3372 = vrcp.f32 %v745_v36 }
 0x626   :  { %v751_v5 = vpop.xlane.xlu1 %750 }
 0x627   :  { %3374 = vrcp.f32 %v751_v5 }
 0x628   :  { %3376 = vrcp.f32 %v754_v37 }
 0x62a   :  { %v1123_v41 = vpop.permute.xlu1 %1122 }
 0x62b   :  { %v1128_v49 = vand.u32 %v1123_v41, %v3742_v47 }
 0x62d   :  { %v3373_v38 = vpop.eup %3372 }
 0x62e   :  { %v769_v4 = vmul.f32 %v3373_v38, %v3361_v6 }
 0x630   :  { %v777_v39 = vpack.c.bf16 %v769_v4, %v769_v4  ;;  %v2867_v4 = vld [vmem:[%s4222_s9] ss:$0 sm:$0xff] }
 0x631   :  { %v3375_v7 = vpop.eup %3374 }
 0x632   :  { %3124 = vmatmul.mubr.msk.bf16.vlgmr.msra.gmra.mrb[20].mxu1 %vm784_vm11, %v777_v39  ;;  %v757_v43 = vpop.xlane.xlu0 %756  ;;  %v3377_v9 = vpop.eup %3376  ;;  %v771_v44 = vmul.f32 %v3375_v7, %v3764_v8 }
 0x633   :  { %3134 = vmatpush3.bf16.msra.mxu1 %v1032_v40  ;;  %3378 = vrcp.f32 %v757_v43  ;;  %3135 = vmatprep.mubr.msk.bf16.mxu1 %vm3457_vm1, %v3456_v1  ;;  %v772_v45 = vmul.f32 %v3377_v9, %v3750_v54 }
 0x634   :  { %3145 = vmatprep.subr.bf16.mxu1 %v3456_v1  ;;  %v779_v48 = vpack.c.bf16 %v771_v44, %v771_v44 }
 0x635   :  { %v780_v50 = vpack.c.bf16 %v772_v45, %v772_v45 }
 0x636   :  { %v1075_v42 = vpop.permute.xlu0 %1074 }
 0x637   :  { %v1080_v46 = vand.u32 %v1075_v42, %v3742_v47 }
 0x639   :  { %3140 = vmatpush3.bf16.msra.mxu0 %v1080_v46 }
 0x63a   :  { %3136 = vmatmul.mubr.msk.bf16.vlgmr.msra.gmra.mrb[24].mxu1 %vm784_vm11, %v779_v48  ;;  %3151 = vmatprep.subr.bf16.mxu0 %v3456_v1 }
 0x63b   :  { %3146 = vmatpush3.bf16.msra.mxu1 %v1128_v49  ;;  %3147 = vmatprep.mubr.msk.bf16.mxu1 %vm3457_vm1, %v3456_v1 }
 0x63c   :  { %3142 = vmatmul.mubr.msk.bf16.vlgmr.msra.gmra.mrb[36].mxu0 %vm784_vm11, %v780_v50  ;;  %3159 = vmatprep.subr.bf16.mxu1 %v3456_v1 }
 0x63d   :  { %v3379_v51 = vpop.eup %3378  ;;  %3155 = vmatprep.mubr.msk.bf16.mxu0 %vm3457_vm1, %v3456_v1 }
 0x63e   :  { %v773_v52 = vmul.f32 %v3379_v51, %v3771_v18  ;;  %v3326_v18 = vld [vmem:[%s4221_s8] sm:$0xff]  }
 0x63f   :  { %3152 = vmatpush3.bf16.msra.mxu0 %v3326_v18 }
 0x640   :  { %v781_v54 = vpack.c.bf16 %v773_v52, %v773_v52  ;;  %3153 = vmatprep.subr.bf16.mxu0 %v3456_v1 }
 0x642   :  { %3148 = vmatmul.mubr.msk.bf16.vlgmr.msra.gmra.mrb[28].mxu1 %vm784_vm11, %v781_v54 }
 0x643   :  { %3163 = vmatprep.mubr.msk.bf16.mxu1 %vm3457_vm1, %v3456_v1  ;;  %3154 = vmatpush3.bf16.msra.mxu0 %v3327_v19  ;;  %v3330_v19 = vld [vmem:[%s4227_s14] sm:$0xff]  }
 0x644   :  { %3167 = vmatprep.subr.bf16.mxu0 %v3456_v1 }
 0x664   :  { %v828_v55 = vpop.f32.mrb[24].mxu0 }
 0x665   :  { %1171 = vst.msk [vmem:[#allocation2] sm:$0x1f] %vm1170_vm12, %v828_v55  ;;  %v3107_v56 = vpop.f32.mrb[25].mxu0 }
 0x666   :  { %v831_v57 = vpop.f32.mrb[26].mxu0 }
 0x667   :  { %v3108_v58 = vpop.f32.mrb[27].mxu0  ;;  %v3328_v57 = vld [vmem:[%s4225_s12] sm:$0xff]  }
 0x668   :  { %3160 = vmatpush3.bf16.msra.mxu1 %v3328_v57  ;;  %v3329_v58 = vld [vmem:[%s4225_s12 + $0x8] sm:$0xff]   ;;  %v3334_v57 = vld [vmem:[%s4220_s7 + $0x10] sm:$0xff]  }
 0x669   :  { %3161 = vmatprep.subr.bf16.mxu1 %v3456_v1 }
 0x66c   :  { %3162 = vmatpush3.bf16.msra.mxu1 %v3329_v58  ;;  %v3335_v58 = vld [vmem:[%s4220_s7 + $0x18] sm:$0xff]   ;;  %s2835_s7 = sshll.u32 %s3467_s21, 4  ;;  %s2836_s7 = int_to_ptr.vmem [resolvable:$true] %s2835_s7 }
 0x66d   :  { %3179 = vmatprep.subr.bf16.mxu1 %v3456_v1  ;;  %s3432_s22 = scalar_lea.vmem %s2836_s7, 32  ;;  %p3437_p1 = scmp.lt.s32.totalorder %s2836_s7, %s2836_s7 }
 0x66e   :  { %p3433_p0 = scmp.ne.s32.totalorder %s2836_s7, %s3432_s22  ;;  %p3438_p2 = scmp.lt.s32.totalorder %s3432_s22, %s3432_s22 }
 0x670   :  { %p3439_p3 = por %p3438_p2, %p3437_p1 }
 0x672   :  { %p3440_p4 = pnand %p3439_p3, %p3433_p0 }
 0x6d0   :  { %v876_v59 = vpop.f32.mrb[16].mxu1 }
 0x6d1   :  { %v924_v60 = vpop.f32.mrb[28].mxu0  ;;  %1173 = vrot.lane.b32.xlu0 %v876_v59, %s3464_s27  ;;  %v3113_v61 = vpop.f32.mrb[17].mxu1 }
 0x6d2   :  { %v3119_v62 = vpop.f32.mrb[29].mxu0  ;;  %v879_v63 = vpop.f32.mrb[18].mxu1 }
 0x6d3   :  { %v927_v2 = vpop.f32.mrb[30].mxu0  ;;  %v3114_v11 = vpop.f32.mrb[19].mxu1 }
 0x6d4   :  { %v3120_v6 = vpop.f32.mrb[31].mxu0 }
 0x6d5   :  { %1179 = vrot.lane.b32.xlu0 %v924_v60, %s3465_s28 }
 0x6dc   :  { %v1020_v53 = vpop.f32.mrb[32].mxu0 }
 0x6dd   :  { %1190 = vst.msk [vmem:[#allocation2 + $0x5] sm:$0x1f] %vm1170_vm12, %v1020_v53  ;;  %v3131_v3 = vpop.f32.mrb[33].mxu0  ;;  %v2871_v53 = vld [vmem:[%s4223_s10] ss:$0 sm:$0xff] }
 0x6de   :  { %v1023_v8 = vpop.f32.mrb[34].mxu0 }
 0x6df   :  { %v3132_v10 = vpop.f32.mrb[35].mxu0 }
 0x705   :  { %v972_v12 = vpop.f32.mrb[20].mxu1 }
 0x706   :  { %v3125_v14 = vpop.f32.mrb[21].mxu1  ;;  %1185 = vrot.lane.b32.xlu0 %v972_v12, %s3466_s29  ;;  %v2872_v12 = vld [vmem:[%s4224_s11] ss:$0 sm:$0xff] }
 0x707   :  { %v975_v15 = vpop.f32.mrb[22].mxu1 }
 0x708   :  { %v3126_v17 = vpop.f32.mrb[23].mxu1 }
 0x70d   :  { %v1068_v20 = vpop.f32.mrb[24].mxu1 }
 0x70e   :  { %1192 = vrot.lane.b32.xlu1 %v1068_v20, %s3464_s27  ;;  %v3137_v21 = vpop.f32.mrb[25].mxu1  ;;  %v3331_v20 = vld [vmem:[%s4227_s14 + $0x8] sm:$0xff]  }
 0x70f   :  { %v1071_v23 = vpop.f32.mrb[26].mxu1  ;;  %v1116_v24 = vpop.f32.mrb[36].mxu0  ;;  %v3332_v21 = vld [vmem:[%s4227_s14 + $0x10] sm:$0xff]  }
 0x710   :  { %v3138_v26 = vpop.f32.mrb[27].mxu1  ;;  %v3143_v27 = vpop.f32.mrb[37].mxu0  ;;  %v3333_v23 = vld [vmem:[%s4227_s14 + $0x18] sm:$0xff]  }
 0x711   :  { %v1119_v28 = vpop.f32.mrb[38].mxu0 }
 0x712   :  { %1197 = vrot.lane.b32.xlu1 %v1116_v24, %s3465_s28  ;;  %v3144_v29 = vpop.f32.mrb[39].mxu0  ;;  %v2873_v24 = vld [vmem:[%s4226_s13] ss:$0 sm:$0xff] }
 0x715   :  { %v1164_v30 = vpop.f32.mrb[28].mxu1 }
 0x716   :  { %v3149_v31 = vpop.f32.mrb[29].mxu1  ;;  %1202 = vrot.lane.b32.xlu1 %v1164_v30, %s3466_s29 }
 0x717   :  { %v1167_v16 = vpop.f32.mrb[30].mxu1 }
 0x718   :  { %v3150_v32 = vpop.f32.mrb[31].mxu1 }
 0x743   :  { %v1174_v13 = vpop.permute.xlu0 %1173 }
 0x744   :  { %1177 = vst.msk [vmem:[#allocation2] sm:$0x1f] %vm1176_vm13, %v1174_v13 }
 0x747   :  { %v1180_v0 = vpop.permute.xlu0 %1179 }
 0x748   :  { %1183 = vst.msk [vmem:[#allocation2] sm:$0x1f] %vm1182_vm14, %v1180_v0 }
 0x778   :  { %v1186_v33 = vpop.permute.xlu0 %1185 }
 0x779   :  { %1189 = vst.msk [vmem:[#allocation2] sm:$0x1f] %vm1188_vm15, %v1186_v33 }
 0x780   :  { %v1193_v34 = vpop.permute.xlu1 %1192 }
 0x781   :  { %1195 = vst.msk [vmem:[#allocation2 + $0x5] sm:$0x1f] %vm1176_vm13, %v1193_v34 }
 0x784   :  { %v1198_v35 = vpop.permute.xlu1 %1197 }
 0x785   :  { %1200 = vst.msk [vmem:[#allocation2 + $0x5] sm:$0x1f] %vm1182_vm14, %v1198_v35 }
 0x788   :  { %v1203_v36 = vpop.permute.xlu1 %1202 }
 0x789   :  { %1205 = vst.msk [vmem:[#allocation2 + $0x5] sm:$0x1f] %vm1188_vm15, %v1203_v36 }
 0x790   :  { %v1206_v37 = vld [vmem:[#allocation2] sm:$0xff]  ;;  %v1207_v5 = vld [vmem:[#allocation2 + $0x8] sm:$0x3] }
 0x791   :  { %v1208_v38 = vpack.c.bf16 %v1207_v5, %v1206_v37 }
 0x793   :  { %3156 = vmatmul.mubr.msk.bf16.vlgmr.msra.gmra.mrb[40].mxu0 %vm145_vm5, %v1208_v38 }
 0x794   :  { %3175 = vmatprep.mubr.msk.bf16.mxu0 %vm3457_vm1, %v3456_v1  ;;  %3168 = vmatpush3.bf16.msra.mxu0 %v3330_v19 }
 0x795   :  { %3169 = vmatprep.subr.bf16.mxu0 %v3456_v1 }
 0x798   :  { %3170 = vmatpush3.bf16.msra.mxu0 %v3331_v20 }
 0x799   :  { %3171 = vmatprep.subr.bf16.mxu0 %v3456_v1 }
 0x79c   :  { %3172 = vmatpush3.bf16.msra.mxu0 %v3332_v21 }
 0x79d   :  { %3173 = vmatprep.subr.bf16.mxu0 %v3456_v1 }
 0x7a0   :  { %3174 = vmatpush3.bf16.msra.mxu0 %v3333_v23 }
 0x7a1   :  { %3193 = vmatprep.subr.bf16.mxu0 %v3456_v1 }
 0x866   :  { %v1269_v39 = vpop.f32.mrb[40].mxu0 }
 0x867   :  { %v1270_v7 = vadd.f32 %v2867_v4, %v1269_v39  ;;  %v3157_v40 = vpop.f32.mrb[41].mxu0 }
 0x868   :  { %v1272_v43 = vpop.f32.mrb[42].mxu0 }
 0x869   :  { %v3845_v9 = vadd.f32 %v1270_v7, %v3583_v25  ;;  %v1273_v44 = vadd.f32 %v2867_v4, %v1272_v43  ;;  %v3158_v45 = vpop.f32.mrb[43].mxu0  ;;  %v2877_v4 = vld [vmem:[%s4228_s15] ss:$0 sm:$0xff] }
 0x86b   :  { %v3848_v41 = vadd.f32 %v1273_v44, %v3580_v22  ;;  %v1280_v42 = vsel %vm145_vm5, %v3845_v9, 0.0 }
 0x86c   :  { %1281 = vadd.xlane.f32.xlu0 %v1280_v42 }
 0x86d   :  { %v1283_v46 = vsel %vm149_vm6, %v3848_v41, 0.0 }
 0x86e   :  { %1284 = vadd.xlane.f32.xlu1 %v1283_v46 }
 0x8f9   :  { %v1282_v48 = vpop.xlane.xlu0 %1281 }
 0x8fa   :  { %v1286_v49 = vmul.f32 0.03125, %v1282_v48 }
 0x8fb   :  { %v1285_v50 = vpop.xlane.xlu1 %1284 }
 0x8fc   :  { %v1288_v51 = vsub.f32 %v3845_v9, %v1286_v49  ;;  %v1287_v25 = vmul.f32 0.03125, %v1285_v50 }
 0x8fe   :  { %v1289_v52 = vsub.f32 %v3848_v41, %v1287_v25  ;;  %v1290_v54 = vmul.f32 %v1288_v51, %v1288_v51 }
 0x900   :  { %v1292_v22 = vsel %vm145_vm5, %v1290_v54, 0.0  ;;  %v1291_v55 = vmul.f32 %v1289_v52, %v1289_v52 }
 0x901   :  { %1293 = vadd.xlane.f32.xlu0 %v1292_v22 }
 0x902   :  { %v1295_v56 = vsel %vm149_vm6, %v1291_v55, 0.0 }
 0x905   :  { %1296 = vadd.xlane.f32.xlu0 %v1295_v56 }
 0x98e   :  { %v1294_v59 = vpop.xlane.xlu0 %1293 }
 0x98f   :  { %v1298_v60 = vmul.f32 0.03125, %v1294_v59 }
 0x991   :  { %v1300_v61 = vadd.f32 1e-05, %v1298_v60 }
 0x992   :  { %v1297_v62 = vpop.xlane.xlu0 %1296 }
 0x993   :  { %3380 = vrsqrt.f32 %v1300_v61  ;;  %v1299_v63 = vmul.f32 0.03125, %v1297_v62 }
 0x995   :  { %v1301_v2 = vadd.f32 1e-05, %v1299_v63 }
 0x997   :  { %3382 = vrsqrt.f32 %v1301_v2 }
 0x99d   :  { %v3381_v11 = vpop.eup %3380 }
 0x99e   :  { %v1304_v6 = vmul.f32 %v3381_v11, %v1288_v51 }
 0x9a0   :  { %v1312_v8 = vmul.f32 %v2871_v53, %v1304_v6  ;;  %v2885_v6 = vld [vmem:[%s4218_s5 + $0x1] ss:$0 sm:$0xff] }
 0x9a1   :  { %v3383_v3 = vpop.eup %3382 }
 0x9a2   :  { %v1305_v10 = vmul.f32 %v3383_v3, %v1289_v52  ;;  %v1320_v15 = vadd.f32 %v2872_v12, %v1312_v8 }
 0x9a4   :  { %v1313_v14 = vmul.f32 %v2871_v53, %v1305_v10 }
 0x9a6   :  { %v1321_v17 = vadd.f32 %v2872_v12, %v1313_v14  ;;  %v2886_v12 = vld [vmem:[%s4219_s6 + $0x1] ss:$0 sm:$0xff] }
 0x9a8   :  { %v1322_v18 = vpack.c.bf16 %v1321_v17, %v1320_v15 }
 0x9aa   :  { %3164 = vmatmul.mubr.msk.bf16.vlgmr.msra.gmra.mrb[32].mxu1 %vm145_vm5, %v1322_v18 }
 0x9ab   :  { %3183 = vmatprep.mubr.msk.bf16.mxu1 %vm3457_vm1, %v3456_v1  ;;  %3180 = vmatpush3.bf16.msra.mxu1 %v3334_v57 }
 0x9ac   :  { %3181 = vmatprep.subr.bf16.mxu1 %v3456_v1 }
 0x9af   :  { %3182 = vmatpush3.bf16.msra.mxu1 %v3335_v58 }
 0x9b0   :  { %3187 = vmatprep.subr.bf16.mxu1 %v3456_v1 }
 0xa7d   :  { %v1383_v26 = vpop.f32.mrb[32].mxu1 }
 0xa7e   :  { %v1384_v27 = vadd.f32 %v2873_v24, %v1383_v26  ;;  %v3165_v28 = vpop.f32.mrb[33].mxu1 }
 0xa7f   :  { %v1386_v29 = vpop.f32.mrb[34].mxu1 }
 0xa80   :  { %v1392_v30 = vmul.f32 0.70710677, %v1384_v27  ;;  %v1387_v31 = vadd.f32 %v2873_v24, %v1386_v29  ;;  %v3166_v16 = vpop.f32.mrb[35].mxu1  ;;  %v1390_v34 = vmul.f32 0.5, %v1384_v27 }
 0xa82   :  { %3384 = verf.f32 %v1392_v30  ;;  %v1393_v32 = vmul.f32 0.70710677, %v1387_v31  ;;  %v1391_v35 = vmul.f32 0.5, %v1387_v31 }
 0xa84   :  { %3386 = verf.f32 %v1393_v32 }
 0xa8c   :  { %v3385_v13 = vpop.eup %3384 }
 0xa8d   :  { %v1396_v0 = vadd.f32 1.0, %v3385_v13 }
 0xa8e   :  { %v3387_v33 = vpop.eup %3386 }
 0xa8f   :  { %v1397_v36 = vadd.f32 1.0, %v3387_v33  ;;  %v1398_v37 = vmul.f32 %v1396_v0, %v1390_v34 }
 0xa91   :  { %v1399_v5 = vmul.f32 %v1397_v36, %v1391_v35 }
 0xa93   :  { %v1400_v38 = vpack.c.bf16 %v1399_v5, %v1398_v37 }
 0xa95   :  { %3176 = vmatmul.mubr.msk.bf16.vlgmr.msra.gmra.mrb[44].mxu0 %vm1440_vm0, %v1400_v38 }
 0xa96   :  { %3195 = vmatprep.mubr.msk.bf16.mxu0 %vm3457_vm1, %v3456_v1 }
 0xb68   :  { %v1478_v39 = vpop.f32.mrb[44].mxu0 }
 0xb69   :  { %v1479_v7 = vadd.f32 %v2877_v4, %v1478_v39  ;;  %v3177_v40 = vpop.f32.mrb[45].mxu0 }
 0xb6a   :  { %v1481_v43 = vpop.f32.mrb[46].mxu0 }
 0xb6b   :  { %v3901_v44 = vadd.f32 %v1479_v7, %v3845_v9  ;;  %v1482_v45 = vadd.f32 %v2877_v4, %v1481_v43  ;;  %v3178_v42 = vpop.f32.mrb[47].mxu0 }
 0xb6d   :  { %v3904_v46 = vadd.f32 %v1482_v45, %v3848_v41  ;;  %v1491_v48 = vsel %vm145_vm5, %v3901_v44, 0.0 }
 0xb6e   :  { %1492 = vadd.xlane.f32.xlu0 %v1491_v48 }
 0xb6f   :  { %v1494_v49 = vsel %vm149_vm6, %v3904_v46, 0.0 }
 0xb70   :  { %1495 = vadd.xlane.f32.xlu1 %v1494_v49 }
 0xbfb   :  { %v1493_v50 = vpop.xlane.xlu0 %1492 }
 0xbfc   :  { %v1497_v51 = vmul.f32 0.03125, %v1493_v50 }
 0xbfd   :  { %v1496_v25 = vpop.xlane.xlu1 %1495 }
 0xbfe   :  { %v1499_v52 = vsub.f32 %v3901_v44, %v1497_v51  ;;  %v1498_v9 = vmul.f32 0.03125, %v1496_v25 }
 0xc00   :  { %v1500_v54 = vsub.f32 %v3904_v46, %v1498_v9  ;;  %v1501_v22 = vmul.f32 %v1499_v52, %v1499_v52 }
 0xc02   :  { %v1503_v41 = vsel %vm145_vm5, %v1501_v22, 0.0  ;;  %v1502_v55 = vmul.f32 %v1500_v54, %v1500_v54 }
 0xc03   :  { %1504 = vadd.xlane.f32.xlu0 %v1503_v41 }
 0xc04   :  { %v1506_v56 = vsel %vm149_vm6, %v1502_v55, 0.0 }
 0xc05   :  { %1507 = vadd.xlane.f32.xlu1 %v1506_v56 }
 0xc90   :  { %v1505_v59 = vpop.xlane.xlu0 %1504 }
 0xc91   :  { %v1509_v60 = vmul.f32 0.03125, %v1505_v59 }
 0xc92   :  { %v1508_v61 = vpop.xlane.xlu1 %1507 }
 0xc93   :  { %v1511_v62 = vadd.f32 1e-05, %v1509_v60  ;;  %v1510_v63 = vmul.f32 0.03125, %v1508_v61 }
 0xc95   :  { %3388 = vrsqrt.f32 %v1511_v62  ;;  %v1512_v2 = vadd.f32 1e-05, %v1510_v63 }
 0xc97   :  { %3390 = vrsqrt.f32 %v1512_v2 }
 0xc9f   :  { %v3389_v11 = vpop.eup %3388 }
 0xca0   :  { %v1515_v53 = vmul.f32 %v3389_v11, %v1499_v52 }
 0xca1   :  { %v3391_v3 = vpop.eup %3390 }
 0xca2   :  { %v1523_v8 = vmul.f32 %v2885_v6, %v1515_v53  ;;  %v1516_v10 = vmul.f32 %v3391_v3, %v1500_v54 }
 0xca4   :  { %v1524_v14 = vmul.f32 %v2885_v6, %v1516_v10  ;;  %v1531_v15 = vadd.f32 %v2886_v12, %v1523_v8 }
 0xca6   :  { %v1532_v17 = vadd.f32 %v2886_v12, %v1524_v14 }
 0xca8   :  { %v1533_v18 = vpack.c.bf16 %v1532_v17, %v1531_v15 }
 0xcaa   :  { %3184 = vmatmul.mubr.msk.bf16.vlgmr.msra.gmra.mrb[36].mxu1 %vm145_vm5, %v1533_v18 }
 0xcab   :  { %3189 = vmatprep.mubr.msk.bf16.mxu1 %vm3457_vm1, %v3456_v1 }
 0xd7d   :  { %v1588_v19 = vpop.f32.mrb[36].mxu1 }
 0xd7e   :  { %1599 = vrot.lane.b32.xlu1 %v1588_v19, %s3458_s23  ;;  %1596 = vrot.lane.b32.xlu0 %v1588_v19, %s3459_s24  ;;  %v3185_v20 = vpop.f32.mrb[37].mxu1  ;;  %v1606_v26 = vrot.slane %v1588_v19, 5  ;;  %v3936_v28 = vpack.c.bf16 %v1588_v19, %v1588_v19 }
 0xd7f   :  { %v1591_v21 = vpop.f32.mrb[38].mxu1 }
 0xd80   :  { %v1607_v23 = vrot.slane %v1591_v21, 5  ;;  %v3186_v24 = vpop.f32.mrb[39].mxu1 }
 0xd82   :  { %1602 = vrot.lane.b32.xlu1 %v1588_v19, %s3460_s25  ;;  %v1608_v27 = vsel %vm262_vm7, %v1606_v26, %v1607_v23 }
 0xd83   :  { %1613 = vrot.lane.b32.xlu0 %v1608_v27, %s3458_s23  ;;  %v3952_v33 = vpack.c.bf16 %v1608_v27, %v1608_v27 }
 0xd86   :  { %1610 = vrot.lane.b32.xlu1 %v1608_v27, %s3459_s24 }
 0xd87   :  { %1628 = vrot.lane.b32.xlu0 %v3936_v28, %s3461_s1 }
 0xd8a   :  { %1616 = vrot.lane.b32.xlu1 %v1608_v27, %s3460_s25 }
 0xdf0   :  { %v1600_v29 = vpop.permute.xlu1 %1599  ;;  %v1597_v30 = vpop.permute.xlu0 %1596 }
 0xdf1   :  { %v3942_v31 = vpack.c.bf16 %v1600_v29, %v1600_v29  ;;  %v3944_v16 = vpack.c.bf16 %v1597_v30, %v1597_v30 }
 0xdf3   :  { %1726 = vrot.lane.b32.xlu0 %v3942_v31, %s3461_s1  ;;  %1677 = vrot.lane.b32.xlu1 %v3944_v16, %s3461_s1 }
 0xdf4   :  { %v1603_v32 = vpop.permute.xlu1 %1602 }
 0xdf5   :  { %v3950_v13 = vpack.c.bf16 %v1603_v32, %v1603_v32  ;;  %v1614_v0 = vpop.permute.xlu0 %1613 }
 0xdf6   :  { %v3960_v37 = vpack.c.bf16 %v1614_v0, %v1614_v0 }
 0xdf7   :  { %1775 = vrot.lane.b32.xlu1 %v3950_v13, %s3461_s1  ;;  %1824 = vrot.lane.b32.xlu0 %v3952_v33, %s3461_s1 }
 0xdf8   :  { %v1611_v34 = vpop.permute.xlu1 %1610 }
 0xdf9   :  { %v3958_v35 = vpack.c.bf16 %v1611_v34, %v1611_v34  ;;  %v1629_v36 = vpop.permute.xlu0 %1628 }
 0xdfa   :  { %v1634_v5 = vsel %vm287_vm8, %v1629_v36, 0 }
 0xdfb   :  { %3188 = vmatpush3.bf16.xpose.msra.mxu1 %v1634_v5  ;;  %1873 = vrot.lane.b32.xlu1 %v3958_v35, %s3461_s1 }
 0xdfc   :  { %1922 = vrot.lane.b32.xlu0 %v3960_v37, %s3461_s1  ;;  %v1617_v38 = vpop.permute.xlu1 %1616  ;;  %3199 = vmatprep.subr.bf16.mxu1 %v3456_v1 }
 0xdfd   :  { %v3968_v4 = vpack.c.bf16 %v1617_v38, %v1617_v38 }
 0xdff   :  { %1971 = vrot.lane.b32.xlu1 %v3968_v4, %s3461_s1 }
 0xe02   :  { %3190 = vmatmul.mubr.msk.bf16.vlgmr.msra.gmra.mrb[40].mxu1 %vm287_vm8, %v3936_v28 }
 0xe03   :  { %3201 = vmatprep.mubr.msk.bf16.mxu1 %vm3457_vm1, %v3456_v1 }
 0xe65   :  { %v1727_v39 = vpop.permute.xlu0 %1726  ;;  %v1678_v7 = vpop.permute.xlu1 %1677 }
 0xe66   :  { %v1732_v40 = vsel %vm287_vm8, %v1727_v39, 0  ;;  %v1683_v43 = vsel %vm287_vm8, %v1678_v7, 0 }
 0xe67   :  { %3194 = vmatpush3.bf16.xpose.msra.mxu0 %v1683_v43  ;;  %3200 = vmatpush3.bf16.xpose.msra.mxu1 %v1732_v40 }
 0xe68   :  { %3205 = vmatprep.subr.bf16.mxu0 %v3456_v1  ;;  %3211 = vmatprep.subr.bf16.mxu1 %v3456_v1 }
 0xe69   :  { %v1776_v45 = vpop.permute.xlu1 %1775  ;;  %v1825_v42 = vpop.permute.xlu0 %1824 }
 0xe6a   :  { %v1781_v48 = vsel %vm287_vm8, %v1776_v45, 0  ;;  %v1830_v49 = vsel %vm287_vm8, %v1825_v42, 0 }
 0xe6d   :  { %v1874_v50 = vpop.permute.xlu1 %1873 }
 0xe6e   :  { %3196 = vmatmul.mubr.msk.bf16.vlgmr.msra.gmra.mrb[48].mxu0 %vm287_vm8, %v3944_v16  ;;  %3202 = vmatmul.mubr.msk.bf16.vlgmr.msra.gmra.mrb[44].mxu1 %vm287_vm8, %v3942_v31  ;;  %v1923_v51 = vpop.permute.xlu0 %1922  ;;  %v1879_v25 = vsel %vm287_vm8, %v1874_v50, 0 }
 0xe6f   :  { %3206 = vmatpush3.bf16.xpose.msra.mxu0 %v1781_v48  ;;  %3212 = vmatpush3.bf16.xpose.msra.mxu1 %v1830_v49  ;;  %v1928_v52 = vsel %vm287_vm8, %v1923_v51, 0 }
 0xe70   :  { %3207 = vmatprep.mubr.msk.bf16.mxu0 %vm3457_vm1, %v3456_v1  ;;  %3213 = vmatprep.mubr.msk.bf16.mxu1 %vm3457_vm1, %v3456_v1 }
 0xe71   :  { %3217 = vmatprep.subr.bf16.mxu0 %v3456_v1  ;;  %3223 = vmatprep.subr.bf16.mxu1 %v3456_v1  ;;  %v1972_v9 = vpop.permute.xlu1 %1971 }
 0xe72   :  { %v1977_v54 = vsel %vm287_vm8, %v1972_v9, 0 }
 0xe76   :  { %3208 = vmatmul.mubr.msk.bf16.vlgmr.msra.gmra.mrb[52].mxu0 %vm287_vm8, %v3950_v13  ;;  %3214 = vmatmul.mubr.msk.bf16.vlgmr.msra.gmra.mrb[48].mxu1 %vm287_vm8, %v3952_v33 }
 0xe77   :  { %3218 = vmatpush3.bf16.xpose.msra.mxu0 %v1879_v25  ;;  %3224 = vmatpush3.bf16.xpose.msra.mxu1 %v1928_v52 }
 0xe78   :  { %3219 = vmatprep.mubr.msk.bf16.mxu0 %vm3457_vm1, %v3456_v1  ;;  %3225 = vmatprep.mubr.msk.bf16.mxu1 %vm3457_vm1, %v3456_v1 }
 0xe79   :  { %3229 = vmatprep.subr.bf16.mxu0 %v3456_v1  ;;  %3235 = vmatprep.subr.bf16.mxu1 %v3456_v1 }
 0xe7e   :  { %3220 = vmatmul.mubr.msk.bf16.vlgmr.msra.gmra.mrb[56].mxu0 %vm287_vm8, %v3958_v35  ;;  %3226 = vmatmul.mubr.msk.bf16.vlgmr.msra.gmra.mrb[52].mxu1 %vm287_vm8, %v3960_v37 }
 0xe7f   :  { %3230 = vmatpush3.bf16.xpose.msra.mxu0 %v1977_v54  ;;  %3231 = vmatprep.mubr.msk.bf16.mxu0 %vm3457_vm1, %v3456_v1 }
 0xe80   :  { %3241 = vmatprep.subr.bf16.mxu0 %v3456_v1  ;;  %3237 = vmatprep.mubr.msk.bf16.mxu1 %vm3457_vm1, %v3456_v1 }
 0xe86   :  { %3232 = vmatmul.mubr.msk.bf16.vlgmr.msra.gmra.mrb[60].mxu0 %vm287_vm8, %v3968_v4 }
 0xe87   :  { %3243 = vmatprep.mubr.msk.bf16.mxu0 %vm3457_vm1, %v3456_v1 }
 0xed5   :  { %v1670_v22 = vpop.f32.mrb[40].mxu1 }
 0xed6   :  { %v2019_v41 = vmul.f32 0.35355338, %v1670_v22  ;;  %v3191_v55 = vpop.f32.mrb[41].mxu1 }
 0xed7   :  { %v1673_v56 = vpop.f32.mrb[42].mxu1 }
 0xed8   :  { %v3192_v57 = vpop.f32.mrb[43].mxu1  ;;  %v2027_v58 = vsel %vm685_vm9, %v2019_v41, -inf }
 0xed9   :  { %2028 = vmax.xlane.f32.xlu0 %v2027_v58 }
 0xf41   :  { %v1719_v59 = vpop.f32.mrb[48].mxu0  ;;  %v1768_v60 = vpop.f32.mrb[44].mxu1 }
 0xf42   :  { %v4019_v61 = vmul.f32 0.35355338, %v1719_v59  ;;  %v2021_v62 = vmul.f32 0.35355338, %v1768_v60  ;;  %v3197_v63 = vpop.f32.mrb[49].mxu0  ;;  %v3203_v2 = vpop.f32.mrb[45].mxu1 }
 0xf43   :  { %v1722_v11 = vpop.f32.mrb[50].mxu0  ;;  %v1771_v6 = vpop.f32.mrb[46].mxu1 }
 0xf44   :  { %v3198_v53 = vpop.f32.mrb[51].mxu0  ;;  %v3204_v3 = vpop.f32.mrb[47].mxu1  ;;  %v2033_v8 = vsel %vm685_vm9, %v2021_v62, -inf  ;;  %v2030_v10 = vsel %vm685_vm9, %v4019_v61, -inf }
 0xf45   :  { %2034 = vmax.xlane.f32.xlu0 %v2033_v8  ;;  %2031 = vmax.xlane.f32.xlu1 %v2030_v10 }
 0xf49   :  { %v1817_v12 = vpop.f32.mrb[52].mxu0  ;;  %v1866_v14 = vpop.f32.mrb[48].mxu1 }
 0xf4a   :  { %v4024_v15 = vmul.f32 0.35355338, %v1817_v12  ;;  %v3209_v17 = vpop.f32.mrb[53].mxu0  ;;  %v3215_v18 = vpop.f32.mrb[49].mxu1  ;;  %v2023_v21 = vmul.f32 0.35355338, %v1866_v14 }
 0xf4b   :  { %v1820_v19 = vpop.f32.mrb[54].mxu0  ;;  %v1869_v20 = vpop.f32.mrb[50].mxu1 }
 0xf4c   :  { %v3210_v23 = vpop.f32.mrb[55].mxu0  ;;  %v3216_v24 = vpop.f32.mrb[51].mxu1  ;;  %v2036_v26 = vsel %vm685_vm9, %v4024_v15, -inf  ;;  %v2039_v27 = vsel %vm685_vm9, %v2023_v21, -inf }
 0xf4d   :  { %2037 = vmax.xlane.f32.xlu0 %v2036_v26 }
 0xf51   :  { %v1964_v29 = vpop.f32.mrb[52].mxu1  ;;  %2040 = vmax.xlane.f32.xlu0 %v2039_v27  ;;  %v1915_v30 = vpop.f32.mrb[56].mxu0 }
 0xf52   :  { %v2025_v32 = vmul.f32 0.35355338, %v1964_v29  ;;  %v4029_v0 = vmul.f32 0.35355338, %v1915_v30  ;;  %v3221_v34 = vpop.f32.mrb[57].mxu0  ;;  %v3227_v36 = vpop.f32.mrb[53].mxu1 }
 0xf53   :  { %v1918_v5 = vpop.f32.mrb[58].mxu0  ;;  %v1967_v38 = vpop.f32.mrb[54].mxu1 }
 0xf54   :  { %v3222_v39 = vpop.f32.mrb[59].mxu0  ;;  %v3228_v7 = vpop.f32.mrb[55].mxu1  ;;  %v2045_v40 = vsel %vm685_vm9, %v2025_v32, -inf  ;;  %v2042_v43 = vsel %vm685_vm9, %v4029_v0, -inf }
 0xf55   :  { %2046 = vmax.xlane.f32.xlu0 %v2045_v40  ;;  %2043 = vmax.xlane.f32.xlu1 %v2042_v43 }
 0xf59   :  { %v2013_v45 = vpop.f32.mrb[60].mxu0 }
 0xf5a   :  { %v3233_v42 = vpop.f32.mrb[61].mxu0  ;;  %v4037_v54 = vmul.f32 0.35355338, %v2013_v45 }
 0xf5b   :  { %v2016_v48 = vpop.f32.mrb[62].mxu0 }
 0xf5c   :  { %v3234_v49 = vpop.f32.mrb[63].mxu0  ;;  %v2048_v22 = vsel %vm685_vm9, %v4037_v54, -inf }
 0xf66   :  { %v2029_v50 = vpop.xlane.xlu0 %2028  ;;  %2123 = vrot.lane.b32.xlu1 %v3936_v28, %s3462_s26 }
 0xf67   :  { %v2051_v51 = vsub.f32 %v2019_v41, %v2029_v50 }
 0xf69   :  { %v2059_v25 = vmul.f32 1.442695, %v2051_v51 }
 0xf6b   :  { %3392 = vpow2.f32 %v2059_v25 }
 0xf75   :  { %v3393_v52 = vpop.eup %3392 }
 0xf76   :  { %v2075_v9 = vsel %vm685_vm9, %v3393_v52, 0.0 }
 0xf77   :  { %2076 = vadd.xlane.f32.xlu0 %v2075_v9 }
 0xf8a   :  { %2049 = vmax.xlane.f32.xlu1 %v2048_v22 }
 0xf8d   :  { %2171 = vrot.lane.b32.xlu0 %v3944_v16, %s3462_s26 }
 0xf9b   :  { %2219 = vrot.lane.b32.xlu1 %v3942_v31, %s3462_s26 }
 0xf9f   :  { %2267 = vrot.lane.b32.xlu1 %v3950_v13, %s3462_s26 }
 0xfa3   :  { %2315 = vrot.lane.b32.xlu1 %v3952_v33, %s3462_s26 }
 0xfd2   :  { %v2035_v28 = vpop.xlane.xlu0 %2034  ;;  %v2032_v41 = vpop.xlane.xlu1 %2031 }
 0xfd3   :  { %v2053_v55 = vsub.f32 %v2021_v62, %v2035_v28  ;;  %v2052_v56 = vsub.f32 %v4019_v61, %v2032_v41 }
 0xfd5   :  { %v2063_v57 = vmul.f32 1.442695, %v2053_v55  ;;  %v2061_v58 = vmul.f32 1.442695, %v2052_v56 }
 0xfd7   :  { %3394 = vpow2.f32 %v2063_v57 }
 0xfd8   :  { %3396 = vpow2.f32 %v2061_v58 }
 0xfda   :  { %v2038_v59 = vpop.xlane.xlu0 %2037 }
 0xfdb   :  { %v2054_v17 = vsub.f32 %v4024_v15, %v2038_v59 }
 0xfdd   :  { %v2065_v19 = vmul.f32 1.442695, %v2054_v17 }
 0xfde   :  { %v2041_v16 = vpop.xlane.xlu0 %2040 }
 0xfdf   :  { %v2055_v60 = vsub.f32 %v2023_v21, %v2041_v16 }
 0xfe1   :  { %v4050_v63 = vpop.eup %3394  ;;  %v2067_v31 = vmul.f32 1.442695, %v2055_v60 }
 0xfe2   :  { %v4052_v2 = vpop.eup %3396  ;;  %v2047_v13 = vpop.xlane.xlu0 %2046  ;;  %v2081_v33 = vsel %vm685_vm9, %v4050_v63, 0.0 }
 0xfe3   :  { %v2044_v11 = vpop.xlane.xlu1 %2043  ;;  %3398 = vpow2.f32 %v2067_v31  ;;  %v2057_v62 = vsub.f32 %v2025_v32, %v2047_v13  ;;  %2082 = vadd.xlane.f32.xlu0 %v2081_v33  ;;  %v2078_v61 = vsel %vm685_vm9, %v4052_v2, 0.0 }
 0xfe4   :  { %2079 = vadd.xlane.f32.xlu1 %v2078_v61  ;;  %v2056_v20 = vsub.f32 %v4029_v0, %v2044_v11 }
 0xfe5   :  { %v2071_v6 = vmul.f32 1.442695, %v2057_v62 }
 0xfe6   :  { %v2069_v24 = vmul.f32 1.442695, %v2056_v20 }
 0xfe7   :  { %v2124_v53 = vpop.permute.xlu1 %2123  ;;  %3400 = vpow2.f32 %v2071_v6 }
 0xfe8   :  { %v2129_v3 = vand.u32 %v2124_v53, %v3742_v47 }
 0xfea   :  { %3236 = vmatpush3.bf16.msra.mxu1 %v2129_v3 }
 0xfeb   :  { %3247 = vmatprep.subr.bf16.mxu1 %v3456_v1 }
 0xfed   :  { %v4060_v8 = vpop.eup %3398 }
 0xfee   :  { %v2087_v10 = vsel %vm685_vm9, %v4060_v8, 0.0 }
 0xfef   :  { %2088 = vadd.xlane.f32.xlu0 %v2087_v10 }
 0xff1   :  { %v4064_v12 = vpop.eup %3400 }
 0xff2   :  { %v2093_v14 = vsel %vm685_vm9, %v4064_v12, 0.0 }
 0xff3   :  { %2094 = vadd.xlane.f32.xlu0 %v2093_v14 }
 0xff5   :  { %2363 = vrot.lane.b32.xlu1 %v3958_v35, %s3462_s26 }
0x1004   :  { %v2077_v18 = vpop.xlane.xlu0 %2076 }
0x1005   :  { %3402 = vrcp.f32 %v2077_v18 }
0x1006   :  { %3404 = vpow2.f32 %v2065_v19 }
0x1007   :  { %3406 = vpow2.f32 %v2069_v24 }
0x1008   :  { %v2172_v21 = vpop.permute.xlu0 %2171 }
0x1009   :  { %v2177_v23 = vand.u32 %v2172_v21, %v3742_v47 }
0x100b   :  { %3242 = vmatpush3.bf16.msra.mxu0 %v2177_v23 }
0x100c   :  { %3253 = vmatprep.subr.bf16.mxu0 %v3456_v1 }
0x100f   :  { %v3403_v26 = vpop.eup %3402 }
0x1010   :  { %v2107_v27 = vmul.f32 %v3403_v26, %v3393_v52  ;;  %v3405_v35 = vpop.eup %3404 }
0x1011   :  { %v2084_v32 = vsel %vm685_vm9, %v3405_v35, 0.0  ;;  %v3407_v0 = vpop.eup %3406 }
0x1012   :  { %v2115_v29 = vpack.c.bf16 %v2107_v27, %v2107_v27  ;;  %v2090_v38 = vsel %vm685_vm9, %v3407_v0, 0.0 }
0x1014   :  { %3238 = vmatmul.mubr.msk.bf16.vlgmr.msra.gmra.mrb[56].mxu1 %vm784_vm11, %v2115_v29 }
0x1015   :  { %3249 = vmatprep.mubr.msk.bf16.mxu1 %vm3457_vm1, %v3456_v1 }
0x1017   :  { %v2050_v15 = vpop.xlane.xlu1 %2049 }
0x1018   :  { %v2058_v30 = vsub.f32 %v4037_v54, %v2050_v15 }
0x1019   :  { %2085 = vadd.xlane.f32.xlu1 %v2084_v32 }
0x101a   :  { %v2073_v34 = vmul.f32 1.442695, %v2058_v30 }
0x101b   :  { %v2220_v36 = vpop.permute.xlu1 %2219 }
0x101c   :  { %3408 = vpow2.f32 %v2073_v34  ;;  %v2225_v5 = vand.u32 %v2220_v36, %v3742_v47 }
0x101d   :  { %2091 = vadd.xlane.f32.xlu1 %v2090_v38  ;;  %v3336_v38 = vld [vmem:[%s4221_s8 + $0x10] sm:$0xff]  }
0x101e   :  { %3248 = vmatpush3.bf16.msra.mxu1 %v2225_v5 }
0x101f   :  { %3259 = vmatprep.subr.bf16.mxu1 %v3456_v1  ;;  %v2268_v40 = vpop.permute.xlu1 %2267 }
0x1023   :  { %v2316_v43 = vpop.permute.xlu1 %2315 }
0x1026   :  { %v4082_v39 = vpop.eup %3408 }
0x1027   :  { %v2096_v7 = vsel %vm685_vm9, %v4082_v39, 0.0 }
0x1028   :  { %2097 = vadd.xlane.f32.xlu0 %v2096_v7 }
0x102e   :  { %2459 = vrot.lane.b32.xlu1 %v3968_v4, %s3462_s26  ;;  %v2321_v4 = vand.u32 %v2316_v43, %v3742_v47 }
0x103e   :  { %2411 = vrot.lane.b32.xlu0 %v3960_v37, %s3462_s26  ;;  %v2273_v37 = vand.u32 %v2268_v40, %v3742_v47 }
0x1070   :  { %v2083_v45 = vpop.xlane.xlu0 %2082 }
0x1071   :  { %3410 = vrcp.f32 %v2083_v45  ;;  %v2080_v42 = vpop.xlane.xlu1 %2079 }
0x1072   :  { %3412 = vrcp.f32 %v2080_v42 }
0x1075   :  { %v2364_v41 = vpop.permute.xlu1 %2363 }
0x107b   :  { %v3411_v48 = vpop.eup %3410 }
0x107c   :  { %v3413_v49 = vpop.eup %3412  ;;  %v2109_v50 = vmul.f32 %v3411_v48, %v4050_v63  ;;  %v2089_v51 = vpop.xlane.xlu0 %2088  ;;  %v2369_v63 = vand.u32 %v2364_v41, %v3742_v47 }
0x107d   :  { %v2108_v25 = vmul.f32 %v3413_v49, %v4052_v2  ;;  %3414 = vrcp.f32 %v2089_v51 }
0x107e   :  { %v2117_v52 = vpack.c.bf16 %v2109_v50, %v2109_v50 }
0x107f   :  { %v2116_v9 = vpack.c.bf16 %v2108_v25, %v2108_v25 }
0x1080   :  { %3250 = vmatmul.mubr.msk.bf16.vlgmr.msra.gmra.mrb[60].mxu1 %vm784_vm11, %v2117_v52  ;;  %v2095_v56 = vpop.xlane.xlu0 %2094 }
0x1081   :  { %3244 = vmatmul.mubr.msk.bf16.vlgmr.msra.gmra.mrb[64].mxu0 %vm784_vm11, %v2116_v9  ;;  %3260 = vmatpush3.bf16.msra.mxu1 %v2321_v4 }
0x1082   :  { %3254 = vmatpush3.bf16.msra.mxu0 %v2273_v37  ;;  %3261 = vmatprep.mubr.msk.bf16.mxu1 %vm3457_vm1, %v3456_v1 }
0x1083   :  { %3255 = vmatprep.mubr.msk.bf16.mxu0 %vm3457_vm1, %v3456_v1  ;;  %3265 = vmatprep.subr.bf16.mxu0 %v3456_v1 }
0x1084   :  { %3271 = vmatprep.subr.bf16.mxu1 %v3456_v1 }
0x1087   :  { %v3415_v54 = vpop.eup %3414 }
0x1088   :  { %v2111_v22 = vmul.f32 %v3415_v54, %v4060_v8 }
0x108a   :  { %v2119_v28 = vpack.c.bf16 %v2111_v22, %v2111_v22 }
0x108c   :  { %3262 = vmatmul.mubr.msk.bf16.vlgmr.msra.gmra.mrb[64].mxu1 %vm784_vm11, %v2119_v28 }
0x108d   :  { %3273 = vmatprep.mubr.msk.bf16.mxu1 %vm3457_vm1, %v3456_v1 }
0x10a6   :  { %v2086_v55 = vpop.xlane.xlu1 %2085 }
0x10a7   :  { %3416 = vrcp.f32 %v2086_v55 }
0x10aa   :  { %v2092_v57 = vpop.xlane.xlu1 %2091 }
0x10ab   :  { %3418 = vrcp.f32 %v2092_v57 }
0x10ac   :  { %3420 = vrcp.f32 %v2095_v56 }
0x10ae   :  { %v2460_v62 = vpop.permute.xlu1 %2459 }
0x10af   :  { %v2465_v53 = vand.u32 %v2460_v62, %v3742_v47 }
0x10b1   :  { %v3417_v58 = vpop.eup %3416 }
0x10b2   :  { %v2110_v59 = vmul.f32 %v3417_v58, %v3405_v35  ;;  %v2915_v58 = vld [vmem:[%s4222_s9 + $0x1] ss:$0 sm:$0xff] }
0x10b4   :  { %v2118_v16 = vpack.c.bf16 %v2110_v59, %v2110_v59 }
0x10b5   :  { %v3419_v60 = vpop.eup %3418  ;;  %v2098_v31 = vpop.xlane.xlu0 %2097 }
0x10b6   :  { %v3421_v2 = vpop.eup %3420  ;;  %3422 = vrcp.f32 %v2098_v31  ;;  %3256 = vmatmul.mubr.msk.bf16.vlgmr.msra.gmra.mrb[68].mxu0 %vm784_vm11, %v2118_v16  ;;  %v2112_v13 = vmul.f32 %v3419_v60, %v3407_v0 }
0x10b7   :  { %3266 = vmatpush3.bf16.msra.mxu0 %v2369_v63  ;;  %3267 = vmatprep.mubr.msk.bf16.mxu0 %vm3457_vm1, %v3456_v1  ;;  %v2113_v11 = vmul.f32 %v3421_v2, %v4064_v12 }
0x10b8   :  { %3277 = vmatprep.subr.bf16.mxu0 %v3456_v1  ;;  %v2120_v6 = vpack.c.bf16 %v2112_v13, %v2112_v13 }
0x10b9   :  { %v2412_v33 = vpop.permute.xlu0 %2411  ;;  %v2121_v3 = vpack.c.bf16 %v2113_v11, %v2113_v11 }
0x10ba   :  { %v2417_v61 = vand.u32 %v2412_v33, %v3742_v47 }
0x10bc   :  { %3272 = vmatpush3.bf16.msra.mxu1 %v2417_v61 }
0x10bd   :  { %3283 = vmatprep.subr.bf16.mxu1 %v3456_v1 }
0x10be   :  { %3268 = vmatmul.mubr.msk.bf16.vlgmr.msra.gmra.mrb[72].mxu0 %vm784_vm11, %v2120_v6 }
0x10bf   :  { %3278 = vmatpush3.bf16.msra.mxu0 %v2465_v53  ;;  %3274 = vmatmul.mubr.msk.bf16.vlgmr.msra.gmra.mrb[68].mxu1 %vm784_vm11, %v2121_v3 }
0x10c0   :  { %v3423_v8 = vpop.eup %3422  ;;  %3279 = vmatprep.mubr.msk.bf16.mxu0 %vm3457_vm1, %v3456_v1  ;;  %3287 = vmatprep.mubr.msk.bf16.mxu1 %vm3457_vm1, %v3456_v1 }
0x10c1   :  { %v2114_v10 = vmul.f32 %v3423_v8, %v4082_v39  ;;  %3291 = vmatprep.subr.bf16.mxu0 %v3456_v1  ;;  %3284 = vmatpush3.bf16.msra.mxu1 %v3336_v38  ;;  %v3337_v39 = vld [vmem:[%s4221_s8 + $0x18] sm:$0xff]   ;;  %v3340_v38 = vld [vmem:[%s4227_s14 + $0x20] sm:$0xff]  }
0x10c2   :  { %3285 = vmatprep.subr.bf16.mxu1 %v3456_v1 }
0x10c3   :  { %v2122_v47 = vpack.c.bf16 %v2114_v10, %v2114_v10 }
0x10c5   :  { %3286 = vmatpush3.bf16.msra.mxu1 %v3337_v39  ;;  %v3341_v39 = vld [vmem:[%s4227_s14 + $0x28] sm:$0xff]  }
0x10c6   :  { %3280 = vmatmul.mubr.msk.bf16.vlgmr.msra.gmra.mrb[76].mxu0 %vm784_vm11, %v2122_v47  ;;  %3299 = vmatprep.subr.bf16.mxu1 %v3456_v1 }
0x10c7   :  { %3295 = vmatprep.mubr.msk.bf16.mxu0 %vm3457_vm1, %v3456_v1 }
0x10e7   :  { %v2165_v12 = vpop.f32.mrb[56].mxu1 }
0x10e8   :  { %2507 = vst.msk [vmem:[#allocation2] sm:$0x1f] %vm1170_vm12, %v2165_v12  ;;  %v3239_v14 = vpop.f32.mrb[57].mxu1 }
0x10e9   :  { %v2168_v17 = vpop.f32.mrb[58].mxu1  ;;  %v3338_v14 = vld [vmem:[%s4225_s12 + $0x10] sm:$0xff]  }
0x10ea   :  { %v3240_v18 = vpop.f32.mrb[59].mxu1  ;;  %3292 = vmatpush3.bf16.msra.mxu0 %v3338_v14  ;;  %v3339_v17 = vld [vmem:[%s4225_s12 + $0x18] sm:$0xff]  }
0x10eb   :  { %3293 = vmatprep.subr.bf16.mxu0 %v3456_v1 }
0x10ee   :  { %3294 = vmatpush3.bf16.msra.mxu0 %v3339_v17 }
0x1153   :  { %v2261_v19 = vpop.f32.mrb[60].mxu1 }
0x1154   :  { %v2213_v20 = vpop.f32.mrb[64].mxu0  ;;  %v3251_v21 = vpop.f32.mrb[61].mxu1 }
0x1155   :  { %2509 = vrot.lane.b32.xlu0 %v2213_v20, %s3464_s27  ;;  %v3245_v23 = vpop.f32.mrb[65].mxu0  ;;  %v2264_v24 = vpop.f32.mrb[62].mxu1 }
0x1156   :  { %v2216_v26 = vpop.f32.mrb[66].mxu0  ;;  %v3252_v27 = vpop.f32.mrb[63].mxu1 }
0x1157   :  { %v3246_v29 = vpop.f32.mrb[67].mxu0 }
0x1158   :  { %v2921_v29 = vld [vmem:[%s4223_s10 + $0x1] ss:$0 sm:$0xff] }
0x1159   :  { %2514 = vrot.lane.b32.xlu0 %v2261_v19, %s3465_s28 }
0x115f   :  { %v2357_v35 = vpop.f32.mrb[64].mxu1 }
0x1160   :  { %2523 = vst.msk [vmem:[#allocation2 + $0x5] sm:$0x1f] %vm1170_vm12, %v2357_v35  ;;  %v3263_v15 = vpop.f32.mrb[65].mxu1 }
0x1161   :  { %v2360_v30 = vpop.f32.mrb[66].mxu1 }
0x1162   :  { %v3264_v32 = vpop.f32.mrb[67].mxu1 }
0x1163   :  { %v2922_v32 = vld [vmem:[%s4224_s11 + $0x1] ss:$0 sm:$0xff] }
0x1189   :  { %v2309_v0 = vpop.f32.mrb[68].mxu0 }
0x118a   :  { %2519 = vrot.lane.b32.xlu0 %v2309_v0, %s3466_s29  ;;  %v3257_v34 = vpop.f32.mrb[69].mxu0 }
0x118b   :  { %v2312_v36 = vpop.f32.mrb[70].mxu0 }
0x118c   :  { %v3258_v5 = vpop.f32.mrb[71].mxu0 }
0x1191   :  { %v2405_v7 = vpop.f32.mrb[72].mxu0 }
0x1192   :  { %2525 = vrot.lane.b32.xlu1 %v2405_v7, %s3464_s27  ;;  %v3269_v40 = vpop.f32.mrb[73].mxu0  ;;  %v2453_v43 = vpop.f32.mrb[68].mxu1  ;;  %v3342_v7 = vld [vmem:[%s4227_s14 + $0x30] sm:$0xff]  }
0x1193   :  { %v2408_v45 = vpop.f32.mrb[74].mxu0  ;;  %v3275_v42 = vpop.f32.mrb[69].mxu1  ;;  %v3343_v40 = vld [vmem:[%s4227_s14 + $0x38] sm:$0xff]  }
0x1194   :  { %v3270_v48 = vpop.f32.mrb[75].mxu0  ;;  %v2456_v49 = vpop.f32.mrb[70].mxu1 }
0x1195   :  { %v3276_v50 = vpop.f32.mrb[71].mxu1 }
0x1196   :  { %2530 = vrot.lane.b32.xlu1 %v2453_v43, %s3465_s28  ;;  %v2928_v43 = vld [vmem:[%s4226_s13 + $0x1] ss:$0 sm:$0xff] }
0x1199   :  { %v2501_v51 = vpop.f32.mrb[76].mxu0 }
0x119a   :  { %2535 = vrot.lane.b32.xlu1 %v2501_v51, %s3466_s29  ;;  %v3281_v25 = vpop.f32.mrb[77].mxu0 }
0x119b   :  { %v2504_v52 = vpop.f32.mrb[78].mxu0 }
0x119c   :  { %v3282_v4 = vpop.f32.mrb[79].mxu0 }
0x11c7   :  { %v2510_v9 = vpop.permute.xlu0 %2509 }
0x11c8   :  { %2512 = vst.msk [vmem:[#allocation2] sm:$0x1f] %vm1176_vm13, %v2510_v9 }
0x11cb   :  { %v2515_v37 = vpop.permute.xlu0 %2514 }
0x11cc   :  { %2517 = vst.msk [vmem:[#allocation2] sm:$0x1f] %vm1182_vm14, %v2515_v37 }
0x11fc   :  { %v2520_v54 = vpop.permute.xlu0 %2519 }
0x11fd   :  { %2522 = vst.msk [vmem:[#allocation2] sm:$0x1f] %vm1188_vm15, %v2520_v54 }
0x1204   :  { %v2526_v22 = vpop.permute.xlu1 %2525 }
0x1205   :  { %2528 = vst.msk [vmem:[#allocation2 + $0x5] sm:$0x1f] %vm1176_vm13, %v2526_v22 }
0x1208   :  { %v2531_v28 = vpop.permute.xlu1 %2530 }
0x1209   :  { %2533 = vst.msk [vmem:[#allocation2 + $0x5] sm:$0x1f] %vm1182_vm14, %v2531_v28 }
0x120c   :  { %v2536_v41 = vpop.permute.xlu1 %2535 }
0x120d   :  { %2538 = vst.msk [vmem:[#allocation2 + $0x5] sm:$0x1f] %vm1188_vm15, %v2536_v41 }
0x1214   :  { %v2539_v55 = vld [vmem:[#allocation2] sm:$0xff]  ;;  %v2540_v56 = vld [vmem:[#allocation2 + $0x8] sm:$0x3] }
0x1215   :  { %v2541_v57 = vpack.c.bf16 %v2540_v56, %v2539_v55  ;;  %v2941_v56 = vld [vmem:[%s4228_s15 + $0x1] ss:$0 sm:$0xff] }
0x1217   :  { %3288 = vmatmul.mubr.msk.bf16.vlgmr.msra.gmra.mrb[72].mxu1 %vm145_vm5, %v2541_v57 }
0x1218   :  { %3307 = vmatprep.mubr.msk.bf16.mxu1 %vm3457_vm1, %v3456_v1  ;;  %3300 = vmatpush3.bf16.msra.mxu1 %v3340_v38  ;;  %vm2825_vm1 = vcmask 253952  }
0x1219   :  { %3301 = vmatprep.subr.bf16.mxu1 %v3456_v1 }
0x121c   :  { %3302 = vmatpush3.bf16.msra.mxu1 %v3341_v39 }
0x121d   :  { %3303 = vmatprep.subr.bf16.mxu1 %v3456_v1 }
0x1220   :  { %3304 = vmatpush3.bf16.msra.mxu1 %v3342_v7 }
0x1221   :  { %3305 = vmatprep.subr.bf16.mxu1 %v3456_v1 }
0x1224   :  { %3306 = vmatpush3.bf16.msra.mxu1 %v3343_v40 }
0x12ea   :  { %v2604_v59 = vpop.f32.mrb[72].mxu1 }
0x12eb   :  { %v2605_v16 = vadd.f32 %v2915_v58, %v2604_v59  ;;  %v3289_v60 = vpop.f32.mrb[73].mxu1 }
0x12ec   :  { %v2607_v63 = vpop.f32.mrb[74].mxu1 }
0x12ed   :  { %v4155_v31 = vadd.f32 %v2605_v16, %v3901_v44  ;;  %v2608_v2 = vadd.f32 %v2915_v58, %v2607_v63  ;;  %v3290_v13 = vpop.f32.mrb[75].mxu1 }
0x12ef   :  { %v2612_v11 = vadd.f32 %v2608_v2, %v3904_v46  ;;  %v2617_v33 = vsel %vm145_vm5, %v4155_v31, 0.0 }
0x12f0   :  { %2618 = vadd.xlane.f32.xlu0 %v2617_v33 }
0x12f1   :  { %v2620_v62 = vsel %vm149_vm6, %v2612_v11, 0.0 }
0x12f2   :  { %2621 = vadd.xlane.f32.xlu1 %v2620_v62 }
0x137d   :  { %v2619_v61 = vpop.xlane.xlu0 %2618 }
0x137e   :  { %v2623_v6 = vmul.f32 0.03125, %v2619_v61 }
0x137f   :  { %v2622_v53 = vpop.xlane.xlu1 %2621 }
0x1380   :  { %v2625_v3 = vsub.f32 %v4155_v31, %v2623_v6  ;;  %v2624_v8 = vmul.f32 0.03125, %v2622_v53 }
0x1382   :  { %v2626_v10 = vsub.f32 %v2612_v11, %v2624_v8  ;;  %v2627_v44 = vmul.f32 %v2625_v3, %v2625_v3 }
0x1384   :  { %v2629_v47 = vsel %vm145_vm5, %v2627_v44, 0.0  ;;  %v2628_v12 = vmul.f32 %v2626_v10, %v2626_v10 }
0x1385   :  { %2630 = vadd.xlane.f32.xlu0 %v2629_v47 }
0x1386   :  { %v2632_v46 = vsel %vm149_vm6, %v2628_v12, 0.0 }
0x1389   :  { %2633 = vadd.xlane.f32.xlu0 %v2632_v46 }
0x1412   :  { %v2631_v18 = vpop.xlane.xlu0 %2630 }
0x1413   :  { %v2635_v19 = vmul.f32 0.03125, %v2631_v18 }
0x1415   :  { %v2637_v20 = vadd.f32 1e-05, %v2635_v19 }
0x1416   :  { %v2634_v21 = vpop.xlane.xlu0 %2633 }
0x1417   :  { %3424 = vrsqrt.f32 %v2637_v20  ;;  %v2636_v23 = vmul.f32 0.03125, %v2634_v21 }
0x1419   :  { %v2638_v24 = vadd.f32 1e-05, %v2636_v23 }
0x141b   :  { %3426 = vrsqrt.f32 %v2638_v24 }
0x1421   :  { %v3425_v26 = vpop.eup %3424 }
0x1422   :  { %v2641_v27 = vmul.f32 %v3425_v26, %v2625_v3 }
0x1424   :  { %v2649_v15 = vmul.f32 %v2921_v29, %v2641_v27 }
0x1425   :  { %v3427_v35 = vpop.eup %3426 }
0x1426   :  { %v2642_v30 = vmul.f32 %v3427_v35, %v2626_v10  ;;  %v2657_v34 = vadd.f32 %v2922_v32, %v2649_v15 }
0x1428   :  { %v2650_v0 = vmul.f32 %v2921_v29, %v2642_v30 }
0x142a   :  { %v2658_v36 = vadd.f32 %v2922_v32, %v2650_v0 }
0x142c   :  { %v2659_v5 = vpack.c.bf16 %v2658_v36, %v2657_v34 }
0x142e   :  { %3296 = vmatmul.mubr.msk.bf16.vlgmr.msra.gmra.mrb[80].mxu0 %vm145_vm5, %v2659_v5 }
0x1501   :  { %v2722_v45 = vpop.f32.mrb[80].mxu0 }
0x1502   :  { %v2723_v42 = vadd.f32 %v2928_v43, %v2722_v45  ;;  %v3297_v48 = vpop.f32.mrb[81].mxu0 }
0x1503   :  { %v2725_v49 = vpop.f32.mrb[82].mxu0 }
0x1504   :  { %v2731_v50 = vmul.f32 0.70710677, %v2723_v42  ;;  %v2726_v51 = vadd.f32 %v2928_v43, %v2725_v49  ;;  %v3298_v25 = vpop.f32.mrb[83].mxu0  ;;  %v2729_v37 = vmul.f32 0.5, %v2723_v42 }
0x1506   :  { %3428 = verf.f32 %v2731_v50  ;;  %v2732_v52 = vmul.f32 0.70710677, %v2726_v51  ;;  %v2730_v54 = vmul.f32 0.5, %v2726_v51 }
0x1508   :  { %3430 = verf.f32 %v2732_v52 }
0x1510   :  { %v3429_v1 = vpop.eup %3428 }
0x1511   :  { %v2735_v4 = vadd.f32 1.0, %v3429_v1 }
0x1512   :  { %v3431_v9 = vpop.eup %3430 }
0x1513   :  { %v2736_v22 = vadd.f32 1.0, %v3431_v9  ;;  %v2737_v28 = vmul.f32 %v2735_v4, %v2729_v37 }
0x1515   :  { %v2738_v41 = vmul.f32 %v2736_v22, %v2730_v54 }
0x1517   :  { %v2739_v55 = vpack.c.bf16 %v2738_v41, %v2737_v28 }
0x1519   :  { %3308 = vmatmul.mubr.msk.bf16.vlgmr.msra.gmra.mrb[76].mxu1 %vm1440_vm0, %v2739_v55 }
0x15ec   :  { %v2818_v57 = vpop.f32.mrb[76].mxu1 }
0x15ed   :  { %v2819_v58 = vadd.f32 %v2941_v56, %v2818_v57  ;;  %v3309_v59 = vpop.f32.mrb[77].mxu1 }
0x15ee   :  { %v2821_v16 = vpop.f32.mrb[78].mxu1 }
0x15ef   :  { %v2824_v60 = vadd.f32 %v2819_v58, %v4155_v31  ;;  %v3310_v63 = vpop.f32.mrb[79].mxu1 }
0x15f1   :  { %2826 = vst.msk [vmem:[#allocation3] sm:$0x1] %vm2825_vm1, %v2824_v60 }
0x15f2   :  { %2828 = vst.msk [vmem:[#allocation3 - $0x4] sm:$0x20] %vm2827_vm2, %v2824_v60 }
0x15f3   :  { %3443 = shalt.err (!%p3440_p4)
}
0x15f4   :  { %s3444_s6 = scalar_lea.hbm %s4229_s16, 32 }
0x15f5   :  { %p3445_p5 = scmp.ne.s32.totalorder %s4229_s16, %s3444_s6  ;;  %p3448_p6 = scmp.lt.u32.totalorder %s3444_s6, %s4229_s16 }
0x15f7   :  { %p3450_p7 = pnand %p3448_p6, %p3445_p5 }
0x15f9   :  { %3453 = shalt.err (!%p3450_p7)
}
0x15fa   :  { %2838 = dma.vmem_to_hbm [thread:$0]  %s2836_s7, 32, %s4229_s16, [#allocation4]  }
0x15fb   :  { %3454 = dma.done.wait [#allocation4], 32  }
0x15fc   :  { %3455 = vsyncadd [#allocation4], 4294967264 }
0x15fd   :  { %2842 = vsyncpa [#allocation4], 1 }

</bundles_post_ra>
